<compile_context>
chip_gen: v6e
topology: v6e:2x2x1
jax: 0.10.0
libtpu: 0.0.40
codegen_flags: <defaults>
</compile_context>

<pallas_src>
import functools
import math

import jax
import jax.numpy as jnp
from jax.experimental import pallas as pl
from jax.experimental.pallas import tpu as pltpu


def cross_attention_kernel(x_ref, y_ref,
                           wq_ref, wkv_ref, wo_ref, bqo_ref, bkv_ref,
                           o_ref,
                           q_scr, m_scr, l_scr, acc_scr,
                           *, n_heads, d_head, scale):
    kv = pl.program_id(1)
    Lq = x_ref.shape[1]
    tkv = y_ref.shape[1]
    d_embed = n_heads * d_head

    # ---- First KV tile of this batch row: project Q once, init accumulators.
    @pl.when(kv == 0)
    def _():
        x = x_ref[0].astype(jnp.bfloat16)                       # (Lq, d_embed)
        q = jnp.dot(x, wq_ref[...],
                    preferred_element_type=jnp.float32) + bqo_ref[0:1, :]
        q = q * scale                                           # fold 1/sqrt(d_head)
        q_scr[...] = pltpu.einshape(
            "mhd->hmd", q.astype(jnp.bfloat16).reshape(Lq, n_heads, d_head))
        m_scr[...] = jnp.full(m_scr.shape, -jnp.inf, jnp.float32)
        l_scr[...] = jnp.zeros(l_scr.shape, jnp.float32)
        acc_scr[...] = jnp.zeros(acc_scr.shape, jnp.float32)

    # ---- Fused K|V projection for this KV tile (one MXU pass over y).
    y = y_ref[0].astype(jnp.bfloat16)                           # (tkv, d_cross)
    kvp = jnp.dot(y, wkv_ref[...],
                  preferred_element_type=jnp.float32) + bkv_ref[...]   # (tkv, 2*d_embed)
    # Split heads for K and V together: first H "heads" are K, last H are V.
    kvh = pltpu.einshape(
        "mhd->hmd", kvp.astype(jnp.bfloat16).reshape(tkv, 2 * n_heads, d_head))
    kh = kvh[:n_heads]                                          # (H, tkv, Dh)
    vh = kvh[n_heads:]                                          # (H, tkv, Dh)

    # ---- Heads-batched scores + online softmax (all f32 elementwise).
    s = jnp.einsum("hqd,hkd->hqk", q_scr[...], kh,
                   preferred_element_type=jnp.float32)          # (H, Lq, tkv)
    m_new = jnp.maximum(m_scr[...], jnp.max(s, axis=-1, keepdims=True))
    alpha = jnp.exp(m_scr[...] - m_new)
    p = jnp.exp(s - m_new)                                      # (H, Lq, tkv) f32
    l_scr[...] = alpha * l_scr[...] + jnp.sum(p, axis=-1, keepdims=True)
    acc_scr[...] = alpha * acc_scr[...] + jnp.einsum(
        "hqk,hkd->hqd", p.astype(jnp.bfloat16), vh,
        preferred_element_type=jnp.float32)                     # (H, Lq, Dh)
    m_scr[...] = m_new

    # ---- Last KV tile: normalize, fuse heads-merge into the output projection.
    @pl.when(kv == pl.num_programs(1) - 1)
    def _():
        o = acc_scr[...] * pl.reciprocal(l_scr[...], approx=True)   # (H, Lq, Dh)
        out_h = jnp.einsum("hqd,hde->hqe", o.astype(jnp.bfloat16), wo_ref[...],
                           preferred_element_type=jnp.float32)      # (H, Lq, d_embed)
        out = jnp.sum(out_h, axis=0) + bqo_ref[1:2, :]               # (Lq, d_embed)
        o_ref[0] = out.astype(o_ref.dtype)


def cross_attention(x, y, params, n_heads, kv_tile=128):
    B, Lq, d_embed = x.shape
    _, Lkv, d_cross = y.shape
    assert d_embed % n_heads == 0
    d_head = d_embed // n_heads
    wq, bq, wk, bk, wv, bv, wo, bo = params

    # Weight prep (wrapper-side, one-time): bf16 MXU operands, fused K|V weight,
    # per-head output weight, packed biases (f32).
    wq_b = wq.astype(jnp.bfloat16)                                   # (d_embed, d_embed)
    wkv_b = jnp.concatenate([wk, wv], axis=1).astype(jnp.bfloat16)   # (d_cross, 2*d_embed)
    wo_h = wo.reshape(n_heads, d_head, d_embed).astype(jnp.bfloat16) # (H, Dh, d_embed)
    bqo = jnp.concatenate([bq, bo], axis=0)                          # (2, d_embed) f32
    bkv = jnp.concatenate([bk, bv], axis=1)                          # (1, 2*d_embed) f32

    # Flash-style KV tiling: single tile for small Lkv, 128-wide tiles otherwise.
    tkv = Lkv if Lkv <= kv_tile else kv_tile
    assert Lkv % tkv == 0, "Lkv must be divisible by the KV tile"
    n_kv = Lkv // tkv

    kernel = functools.partial(cross_attention_kernel,
                               n_heads=n_heads, d_head=d_head,
                               scale=1.0 / math.sqrt(d_head))

    def replicated(arr):
        nd = arr.ndim
        return pl.BlockSpec(arr.shape, lambda b, kv, _nd=nd: (0,) * _nd)

    return pl.pallas_call(
        kernel,
        out_shape=jax.ShapeDtypeStruct((B, Lq, d_embed), x.dtype),
        grid=(B, n_kv),
        in_specs=[
            pl.BlockSpec((1, Lq, d_embed), lambda b, kv: (b, 0, 0)),   # x (const over kv)
            pl.BlockSpec((1, tkv, d_cross), lambda b, kv: (b, kv, 0)), # y KV tile
            replicated(wq_b),
            replicated(wkv_b),
            replicated(wo_h),
            replicated(bqo),
            replicated(bkv),
        ],
        out_specs=pl.BlockSpec((1, Lq, d_embed), lambda b, kv: (b, 0, 0)),
        scratch_shapes=[
            pltpu.VMEM((n_heads, Lq, d_head), jnp.bfloat16),   # cached Q (per head)
            pltpu.VMEM((n_heads, Lq, 1), jnp.float32),         # running max m
            pltpu.VMEM((n_heads, Lq, 1), jnp.float32),         # running sum l
            pltpu.VMEM((n_heads, Lq, d_head), jnp.float32),    # PV accumulator
        ],
        compiler_params=pltpu.CompilerParams(
            dimension_semantics=("parallel", "arbitrary"),
            vmem_limit_bytes=64 * 1024 * 1024,
        ),
    )(x, y, wq_b, wkv_b, wo_h, bqo, bkv)


def reference_cross_attention(x, y, params, n_heads):
    """Pure-JAX f32 reference mirroring the PyTorch forward."""
    wq, bq, wk, bk, wv, bv, wo, bo = params
    B, Lq, d_embed = x.shape
    d_head = d_embed // n_heads

    q = x @ wq + bq[0]
    k = y @ wk + bk[0]
    v = y @ wv + bv[0]

    def split_heads(t):
        Bq, L, _ = t.shape
        return t.reshape(Bq, L, n_heads, d_head).transpose(0, 2, 1, 3)

    qh, kh, vh = split_heads(q), split_heads(k), split_heads(v)
    w = jnp.einsum("bhqd,bhkd->bhqk", qh, kh) / math.sqrt(d_head)
    w = jax.nn.softmax(w, axis=-1)
    o = jnp.einsum("bhqk,bhkd->bhqd", w, vh)
    o = o.transpose(0, 2, 1, 3).reshape(B, Lq, d_embed)
    return o @ wo + bo[0]


if __name__ == "__main__":
    # Small, forward-consistent shapes.
    B, Lq, Lkv = 2, 16, 8
    d_embed, d_cross, n_heads = 32, 16, 4

    key = jax.random.PRNGKey(0)
    keys = jax.random.split(key, 10)

    x = jax.random.normal(keys[0], (B, Lq, d_embed), jnp.float32)
    y = jax.random.normal(keys[1], (B, Lkv, d_cross), jnp.float32)

    # Deterministic synthetic parameters (PyTorch-Linear-equivalent, stored (in, out)).
    wq = 0.05 * jax.random.normal(keys[2], (d_embed, d_embed), jnp.float32)
    bq = 0.01 * jax.random.normal(keys[3], (1, d_embed), jnp.float32)
    wk = 0.05 * jax.random.normal(keys[4], (d_cross, d_embed), jnp.float32)
    bk = 0.01 * jax.random.normal(keys[5], (1, d_embed), jnp.float32)
    wv = 0.05 * jax.random.normal(keys[6], (d_cross, d_embed), jnp.float32)
    bv = 0.01 * jax.random.normal(keys[7], (1, d_embed), jnp.float32)
    wo = 0.05 * jax.random.normal(keys[8], (d_embed, d_embed), jnp.float32)
    bo = 0.01 * jax.random.normal(keys[9], (1, d_embed), jnp.float32)

    params = (wq, bq, wk, bk, wv, bv, wo, bo)

    out = cross_attention(x, y, params, n_heads)
    out = jax.block_until_ready(out)

    ref = reference_cross_attention(x, y, params, n_heads)
    assert out.shape == (B, Lq, d_embed)
    # bf16 MXU operands + approx reciprocal => looser tolerance than f32-exact.
    assert jnp.allclose(out, ref, atol=2e-2, rtol=2e-2), "mismatch vs. JAX reference"

    print("KERNEL_OK")
</pallas_src>

<mosaic_0001>
module attributes {stable_mosaic.version = 11 : i64} {
  func.func @cross_attention_kernel(%arg0: i32, %arg1: i32, %arg2: memref<1x16x32xf32, #tpu.memory_space<vmem>>, %arg3: memref<1x8x16xf32, #tpu.memory_space<vmem>>, %arg4: memref<32x32xbf16, #tpu.memory_space<vmem>>, %arg5: memref<16x64xbf16, #tpu.memory_space<vmem>>, %arg6: memref<4x8x32xbf16, #tpu.memory_space<vmem>>, %arg7: memref<2x32xf32, #tpu.memory_space<vmem>>, %arg8: memref<1x64xf32, #tpu.memory_space<vmem>>, %arg9: memref<1x16x32xf32, #tpu.memory_space<vmem>>, %arg10: memref<4x16x8xbf16, #tpu.memory_space<vmem>>, %arg11: memref<4x16x1xf32, #tpu.memory_space<vmem>>, %arg12: memref<4x16x1xf32, #tpu.memory_space<vmem>>, %arg13: memref<4x16x8xf32, #tpu.memory_space<vmem>>) attributes {dimension_semantics = [#tpu.dimension_semantics<parallel>, #tpu.dimension_semantics<arbitrary>], iteration_bounds = array<i64: 2, 1>, scalar_prefetch = 0 : i64, scratch_operands = 4 : i64, tpu.core_type = #tpu.core_type<tc>, window_params = [{transform_indices = @transform_0, window_bounds = array<i64: 1, 16, 32>}, {transform_indices = @transform_1, window_bounds = array<i64: 1, 8, 16>}, {pipeline_mode = #tpu.pipeline_mode<synchronous>, transform_indices = @transform_2, window_bounds = array<i64: 32, 32>}, {pipeline_mode = #tpu.pipeline_mode<synchronous>, transform_indices = @transform_3, window_bounds = array<i64: 16, 64>}, {pipeline_mode = #tpu.pipeline_mode<synchronous>, transform_indices = @transform_4, window_bounds = array<i64: 4, 8, 32>}, {pipeline_mode = #tpu.pipeline_mode<synchronous>, transform_indices = @transform_5, window_bounds = array<i64: 2, 32>}, {pipeline_mode = #tpu.pipeline_mode<synchronous>, transform_indices = @transform_6, window_bounds = array<i64: 1, 64>}, {transform_indices = @transform_7, window_bounds = array<i64: 1, 16, 32>}]} {
    %c0_i32 = arith.constant 0 : i32
    %0 = arith.cmpi eq, %arg1, %c0_i32 : i32
    %1 = arith.extui %0 : i1 to i32
    %c0_i32_0 = arith.constant 0 : i32
    %2 = arith.cmpi ne, %1, %c0_i32_0 : i32
    scf.if %2 {
      %c0_37 = arith.constant 0 : index
      %c0_38 = arith.constant 0 : index
      %c0_39 = arith.constant 0 : index
      %45 = vector.load %arg2[%c0_37, %c0_38, %c0_39] : memref<1x16x32xf32, #tpu.memory_space<vmem>>, vector<1x16x32xf32>
      %46 = vector.shape_cast %45 : vector<1x16x32xf32> to vector<16x32xf32>
      %47 = arith.truncf %46 : vector<16x32xf32> to vector<16x32xbf16>
      %c0_40 = arith.constant 0 : index
      %c0_41 = arith.constant 0 : index
      %48 = vector.load %arg4[%c0_40, %c0_41] : memref<32x32xbf16, #tpu.memory_space<vmem>>, vector<32x32xbf16>
      %cst_42 = arith.constant dense<0.000000e+00> : vector<16x32xf32>
      %49 = tpu.matmul %47, %48, %cst_42 {dimension_numbers = #tpu.dot_dimension_numbers<[1], [0], [0], [1], [0, 0, 1, 1], [], []>} : vector<16x32xbf16>, vector<32x32xbf16>, vector<16x32xf32> -> vector<16x32xf32>
      %c0_43 = arith.constant 0 : index
      %c0_44 = arith.constant 0 : index
      %50 = vector.load %arg7[%c0_43, %c0_44] : memref<2x32xf32, #tpu.memory_space<vmem>>, vector<1x32xf32>
      %51 = vector.broadcast %50 : vector<1x32xf32> to vector<16x32xf32>
      %52 = arith.addf %49, %51 : vector<16x32xf32>
      %cst_45 = arith.constant 0.353553385 : f32
      %53 = vector.broadcast %cst_45 : f32 to vector<16x32xf32>
      %54 = arith.mulf %52, %53 : vector<16x32xf32>
      %55 = arith.truncf %54 : vector<16x32xf32> to vector<16x32xbf16>
      %56 = vector.shape_cast %55 : vector<16x32xbf16> to vector<16x4x8xbf16>
      %57 = tpu.transpose %56, [1, 0, 2] : vector<16x4x8xbf16> -> vector<4x16x8xbf16>
      %c0_46 = arith.constant 0 : index
      %c0_47 = arith.constant 0 : index
      %c0_48 = arith.constant 0 : index
      %58 = vector.load %arg10[%c0_46, %c0_47, %c0_48] : memref<4x16x8xbf16, #tpu.memory_space<vmem>>, vector<4x16x8xbf16>
      tpu.vector_store %arg10[%c0_46, %c0_47, %c0_48], %57 {strides = array<i32>} : memref<4x16x8xbf16, #tpu.memory_space<vmem>>, vector<4x16x8xbf16>,
      %cst_49 = arith.constant 0xFF800000 : f32
      %59 = vector.broadcast %cst_49 : f32 to vector<4x16x1xf32>
      %c0_50 = arith.constant 0 : index
      %c0_51 = arith.constant 0 : index
      %c0_52 = arith.constant 0 : index
      %60 = vector.load %arg11[%c0_50, %c0_51, %c0_52] : memref<4x16x1xf32, #tpu.memory_space<vmem>>, vector<4x16x1xf32>
      tpu.vector_store %arg11[%c0_50, %c0_51, %c0_52], %59 {strides = array<i32>} : memref<4x16x1xf32, #tpu.memory_space<vmem>>, vector<4x16x1xf32>,
      %cst_53 = arith.constant 0.000000e+00 : f32
      %61 = vector.broadcast %cst_53 : f32 to vector<4x16x1xf32>
      %c0_54 = arith.constant 0 : index
      %c0_55 = arith.constant 0 : index
      %c0_56 = arith.constant 0 : index
      %62 = vector.load %arg12[%c0_54, %c0_55, %c0_56] : memref<4x16x1xf32, #tpu.memory_space<vmem>>, vector<4x16x1xf32>
      tpu.vector_store %arg12[%c0_54, %c0_55, %c0_56], %61 {strides = array<i32>} : memref<4x16x1xf32, #tpu.memory_space<vmem>>, vector<4x16x1xf32>,
      %cst_57 = arith.constant 0.000000e+00 : f32
      %63 = vector.broadcast %cst_57 : f32 to vector<4x16x8xf32>
      %c0_58 = arith.constant 0 : index
      %c0_59 = arith.constant 0 : index
      %c0_60 = arith.constant 0 : index
      %64 = vector.load %arg13[%c0_58, %c0_59, %c0_60] : memref<4x16x8xf32, #tpu.memory_space<vmem>>, vector<4x16x8xf32>
      tpu.vector_store %arg13[%c0_58, %c0_59, %c0_60], %63 {strides = array<i32>} : memref<4x16x8xf32, #tpu.memory_space<vmem>>, vector<4x16x8xf32>,
    } else {
    }
    %c0 = arith.constant 0 : index
    %c0_1 = arith.constant 0 : index
    %c0_2 = arith.constant 0 : index
    %3 = vector.load %arg3[%c0, %c0_1, %c0_2] : memref<1x8x16xf32, #tpu.memory_space<vmem>>, vector<1x8x16xf32>
    %4 = vector.shape_cast %3 : vector<1x8x16xf32> to vector<8x16xf32>
    %5 = arith.truncf %4 : vector<8x16xf32> to vector<8x16xbf16>
    %c0_3 = arith.constant 0 : index
    %c0_4 = arith.constant 0 : index
    %6 = vector.load %arg5[%c0_3, %c0_4] : memref<16x64xbf16, #tpu.memory_space<vmem>>, vector<16x64xbf16>
    %cst = arith.constant dense<0.000000e+00> : vector<8x64xf32>
    %7 = tpu.matmul %5, %6, %cst {dimension_numbers = #tpu.dot_dimension_numbers<[1], [0], [0], [1], [0, 0, 1, 1], [], []>} : vector<8x16xbf16>, vector<16x64xbf16>, vector<8x64xf32> -> vector<8x64xf32>
    %c0_5 = arith.constant 0 : index
    %c0_6 = arith.constant 0 : index
    %8 = vector.load %arg8[%c0_5, %c0_6] : memref<1x64xf32, #tpu.memory_space<vmem>>, vector<1x64xf32>
    %9 = vector.broadcast %8 : vector<1x64xf32> to vector<8x64xf32>
    %10 = arith.addf %7, %9 : vector<8x64xf32>
    %11 = arith.truncf %10 : vector<8x64xf32> to vector<8x64xbf16>
    %12 = vector.shape_cast %11 : vector<8x64xbf16> to vector<8x8x8xbf16>
    %13 = tpu.transpose %12, [1, 0, 2] : vector<8x8x8xbf16> -> vector<8x8x8xbf16>
    %14 = vector.extract_strided_slice %13 {offsets = [0, 0, 0], sizes = [4, 8, 8], strides = [1, 1, 1]} : vector<8x8x8xbf16> to vector<4x8x8xbf16>
    %15 = vector.extract_strided_slice %13 {offsets = [4, 0, 0], sizes = [4, 8, 8], strides = [1, 1, 1]} : vector<8x8x8xbf16> to vector<4x8x8xbf16>
    %c0_7 = arith.constant 0 : index
    %c0_8 = arith.constant 0 : index
    %c0_9 = arith.constant 0 : index
    %16 = vector.load %arg10[%c0_7, %c0_8, %c0_9] : memref<4x16x8xbf16, #tpu.memory_space<vmem>>, vector<4x16x8xbf16>
    "tpu.trace_start"() <{level = 10 : i32, message = "hqd,hkd->hqk"}> : () -> ()
    %cst_10 = arith.constant dense<0.000000e+00> : vector<4x16x8xf32>
    %17 = tpu.matmul %16, %14, %cst_10 {dimension_numbers = #tpu.dot_dimension_numbers<[2], [2], [1], [1], [0, 0, 0, 1, 1, 1], [0], [0]>} : vector<4x16x8xbf16>, vector<4x8x8xbf16>, vector<4x16x8xf32> -> vector<4x16x8xf32>
    "tpu.trace_stop"() : () -> ()
    %c0_11 = arith.constant 0 : index
    %c0_12 = arith.constant 0 : index
    %c0_13 = arith.constant 0 : index
    %18 = vector.load %arg11[%c0_11, %c0_12, %c0_13] : memref<4x16x1xf32, #tpu.memory_space<vmem>>, vector<4x16x1xf32>
    %cst_14 = arith.constant dense<0xFF800000> : vector<4x16xf32>
    %19 = vector.multi_reduction <maximumf>, %17, %cst_14 [2] : vector<4x16x8xf32> to vector<4x16xf32>
    %20 = vector.shape_cast %19 : vector<4x16xf32> to vector<4x16x1xf32>
    %21 = arith.maximumf %18, %20 : vector<4x16x1xf32>
    %c0_15 = arith.constant 0 : index
    %c0_16 = arith.constant 0 : index
    %c0_17 = arith.constant 0 : index
    %22 = vector.load %arg11[%c0_15, %c0_16, %c0_17] : memref<4x16x1xf32, #tpu.memory_space<vmem>>, vector<4x16x1xf32>
    %23 = arith.subf %22, %21 : vector<4x16x1xf32>
    %24 = math.exp %23 : vector<4x16x1xf32>
    %25 = vector.broadcast %21 : vector<4x16x1xf32> to vector<4x16x8xf32>
    %26 = arith.subf %17, %25 : vector<4x16x8xf32>
    %27 = math.exp %26 : vector<4x16x8xf32>
    %c0_18 = arith.constant 0 : index
    %c0_19 = arith.constant 0 : index
    %c0_20 = arith.constant 0 : index
    %28 = vector.load %arg12[%c0_18, %c0_19, %c0_20] : memref<4x16x1xf32, #tpu.memory_space<vmem>>, vector<4x16x1xf32>
    %29 = arith.mulf %24, %28 : vector<4x16x1xf32>
    %cst_21 = arith.constant dense<0.000000e+00> : vector<4x16xf32>
    %30 = vector.multi_reduction <add>, %27, %cst_21 [2] : vector<4x16x8xf32> to vector<4x16xf32>
    %31 = vector.shape_cast %30 : vector<4x16xf32> to vector<4x16x1xf32>
    %32 = arith.addf %29, %31 : vector<4x16x1xf32>
    %c0_22 = arith.constant 0 : index
    %c0_23 = arith.constant 0 : index
    %c0_24 = arith.constant 0 : index
    %33 = vector.load %arg12[%c0_22, %c0_23, %c0_24] : memref<4x16x1xf32, #tpu.memory_space<vmem>>, vector<4x16x1xf32>
    tpu.vector_store %arg12[%c0_22, %c0_23, %c0_24], %32 {strides = array<i32>} : memref<4x16x1xf32, #tpu.memory_space<vmem>>, vector<4x16x1xf32>,
    %c0_25 = arith.constant 0 : index
    %c0_26 = arith.constant 0 : index
    %c0_27 = arith.constant 0 : index
    %34 = vector.load %arg13[%c0_25, %c0_26, %c0_27] : memref<4x16x8xf32, #tpu.memory_space<vmem>>, vector<4x16x8xf32>
    %35 = vector.broadcast %24 : vector<4x16x1xf32> to vector<4x16x8xf32>
    %36 = arith.mulf %35, %34 : vector<4x16x8xf32>
    %37 = arith.truncf %27 : vector<4x16x8xf32> to vector<4x16x8xbf16>
    "tpu.trace_start"() <{level = 10 : i32, message = "hqk,hkd->hqd"}> : () -> ()
    %cst_28 = arith.constant dense<0.000000e+00> : vector<4x16x8xf32>
    %38 = tpu.matmul %37, %15, %cst_28 {dimension_numbers = #tpu.dot_dimension_numbers<[2], [1], [1], [2], [0, 0, 0, 1, 1, 2], [0], [0]>} : vector<4x16x8xbf16>, vector<4x8x8xbf16>, vector<4x16x8xf32> -> vector<4x16x8xf32>
    "tpu.trace_stop"() : () -> ()
    %39 = arith.addf %36, %38 : vector<4x16x8xf32>
    %c0_29 = arith.constant 0 : index
    %c0_30 = arith.constant 0 : index
    %c0_31 = arith.constant 0 : index
    %40 = vector.load %arg13[%c0_29, %c0_30, %c0_31] : memref<4x16x8xf32, #tpu.memory_space<vmem>>, vector<4x16x8xf32>
    tpu.vector_store %arg13[%c0_29, %c0_30, %c0_31], %39 {strides = array<i32>} : memref<4x16x8xf32, #tpu.memory_space<vmem>>, vector<4x16x8xf32>,
    %c0_32 = arith.constant 0 : index
    %c0_33 = arith.constant 0 : index
    %c0_34 = arith.constant 0 : index
    %41 = vector.load %arg11[%c0_32, %c0_33, %c0_34] : memref<4x16x1xf32, #tpu.memory_space<vmem>>, vector<4x16x1xf32>
    tpu.vector_store %arg11[%c0_32, %c0_33, %c0_34], %21 {strides = array<i32>} : memref<4x16x1xf32, #tpu.memory_space<vmem>>, vector<4x16x1xf32>,
    %c0_i32_35 = arith.constant 0 : i32
    %42 = arith.cmpi eq, %arg1, %c0_i32_35 : i32
    %43 = arith.extui %42 : i1 to i32
    %c0_i32_36 = arith.constant 0 : i32
    %44 = arith.cmpi ne, %43, %c0_i32_36 : i32
    scf.if %44 {
      %c0_37 = arith.constant 0 : index
      %c0_38 = arith.constant 0 : index
      %c0_39 = arith.constant 0 : index
      %45 = vector.load %arg13[%c0_37, %c0_38, %c0_39] : memref<4x16x8xf32, #tpu.memory_space<vmem>>, vector<4x16x8xf32>
      %c0_40 = arith.constant 0 : index
      %c0_41 = arith.constant 0 : index
      %c0_42 = arith.constant 0 : index
      %46 = vector.load %arg12[%c0_40, %c0_41, %c0_42] : memref<4x16x1xf32, #tpu.memory_space<vmem>>, vector<4x16x1xf32>
      %47 = tpu.reciprocal %46 {approx = true} : vector<4x16x1xf32> -> vector<4x16x1xf32>
      %48 = vector.broadcast %47 : vector<4x16x1xf32> to vector<4x16x8xf32>
      %49 = arith.mulf %45, %48 : vector<4x16x8xf32>
      %50 = arith.truncf %49 : vector<4x16x8xf32> to vector<4x16x8xbf16>
      %c0_43 = arith.constant 0 : index
      %c0_44 = arith.constant 0 : index
      %c0_45 = arith.constant 0 : index
      %51 = vector.load %arg6[%c0_43, %c0_44, %c0_45] : memref<4x8x32xbf16, #tpu.memory_space<vmem>>, vector<4x8x32xbf16>
      "tpu.trace_start"() <{level = 10 : i32, message = "hqd,hde->hqe"}> : () -> ()
      %cst_46 = arith.constant dense<0.000000e+00> : vector<4x16x32xf32>
      %52 = tpu.matmul %50, %51, %cst_46 {dimension_numbers = #tpu.dot_dimension_numbers<[2], [1], [1], [2], [0, 0, 0, 1, 1, 2], [0], [0]>} : vector<4x16x8xbf16>, vector<4x8x32xbf16>, vector<4x16x32xf32> -> vector<4x16x32xf32>
      "tpu.trace_stop"() : () -> ()
      %cst_47 = arith.constant dense<0.000000e+00> : vector<16x32xf32>
      %53 = vector.multi_reduction <add>, %52, %cst_47 [0] : vector<4x16x32xf32> to vector<16x32xf32>
      %c1 = arith.constant 1 : index
      %c0_48 = arith.constant 0 : index
      %54 = vector.load %arg7[%c1, %c0_48] : memref<2x32xf32, #tpu.memory_space<vmem>>, vector<1x32xf32>
      %55 = vector.broadcast %54 : vector<1x32xf32> to vector<16x32xf32>
      %56 = arith.addf %53, %55 : vector<16x32xf32>
      %c0_49 = arith.constant 0 : index
      %c0_50 = arith.constant 0 : index
      %c0_51 = arith.constant 0 : index
      %57 = vector.load %arg9[%c0_49, %c0_50, %c0_51] : memref<1x16x32xf32, #tpu.memory_space<vmem>>, vector<1x16x32xf32>
      %58 = vector.shape_cast %57 : vector<1x16x32xf32> to vector<16x32xf32>
      %59 = vector.shape_cast %56 : vector<16x32xf32> to vector<1x16x32xf32>
      tpu.vector_store %arg9[%c0_49, %c0_50, %c0_51], %59 {strides = array<i32>} : memref<1x16x32xf32, #tpu.memory_space<vmem>>, vector<1x16x32xf32>,
    } else {
    }
    return
  }
  func.func @transform_0(%arg0: i32, %arg1: i32) -> (i32, i32, i32) {
    %c0_i32 = arith.constant 0 : i32
    %c0_i32_0 = arith.constant 0 : i32
    %c0_i32_1 = arith.constant 0 : i32
    return %arg0, %c0_i32, %c0_i32_0 : i32, i32, i32
  }
  func.func @transform_1(%arg0: i32, %arg1: i32) -> (i32, i32, i32) {
    %c0_i32 = arith.constant 0 : i32
    %c0_i32_0 = arith.constant 0 : i32
    return %arg0, %arg1, %c0_i32 : i32, i32, i32
  }
  func.func @transform_2(%arg0: i32, %arg1: i32) -> (i32, i32) {
    %c0_i32 = arith.constant 0 : i32
    %c0_i32_0 = arith.constant 0 : i32
    %c0_i32_1 = arith.constant 0 : i32
    return %c0_i32, %c0_i32_0 : i32, i32
  }
  func.func @transform_3(%arg0: i32, %arg1: i32) -> (i32, i32) {
    %c0_i32 = arith.constant 0 : i32
    %c0_i32_0 = arith.constant 0 : i32
    %c0_i32_1 = arith.constant 0 : i32
    return %c0_i32, %c0_i32_0 : i32, i32
  }
  func.func @transform_4(%arg0: i32, %arg1: i32) -> (i32, i32, i32) {
    %c0_i32 = arith.constant 0 : i32
    %c0_i32_0 = arith.constant 0 : i32
    %c0_i32_1 = arith.constant 0 : i32
    %c0_i32_2 = arith.constant 0 : i32
    return %c0_i32, %c0_i32_0, %c0_i32_1 : i32, i32, i32
  }
  func.func @transform_5(%arg0: i32, %arg1: i32) -> (i32, i32) {
    %c0_i32 = arith.constant 0 : i32
    %c0_i32_0 = arith.constant 0 : i32
    %c0_i32_1 = arith.constant 0 : i32
    return %c0_i32, %c0_i32_0 : i32, i32
  }
  func.func @transform_6(%arg0: i32, %arg1: i32) -> (i32, i32) {
    %c0_i32 = arith.constant 0 : i32
    %c0_i32_0 = arith.constant 0 : i32
    %c0_i32_1 = arith.constant 0 : i32
    return %c0_i32, %c0_i32_0 : i32, i32
  }
  func.func @transform_7(%arg0: i32, %arg1: i32) -> (i32, i32, i32) {
    %c0_i32 = arith.constant 0 : i32
    %c0_i32_0 = arith.constant 0 : i32
    %c0_i32_1 = arith.constant 0 : i32
    return %arg0, %c0_i32, %c0_i32_0 : i32, i32, i32
  }
}

</mosaic_0001>

<bundles_post_ra>
// kernel: tpu_custom_call.1
= control target key start
LH: loop header
LB: loop body
LE: loop exit
PB: predicated region body
PF: predicated region fallthrough
CT: control target
= control target key end

     0   :  { %s3460_s0 = inlined_call_operand.hbm [shape: f32[2,16,32], index: 0, kind: input, shape index: {}]   ;;  %s3461_s1 = inlined_call_operand.hbm [shape: f32[2,8,16], index: 1, kind: input, shape index: {}]   ;;  %s3462_s2 = inlined_call_operand.hbm [shape: bf16[32,32], index: 2, kind: input, shape index: {}]   ;;  %s3463_s3 = inlined_call_operand.hbm [shape: bf16[16,64], index: 3, kind: input, shape index: {}]   ;;  %s3464_s4 = inlined_call_operand.hbm [shape: bf16[4,8,32], index: 4, kind: input, shape index: {}]   ;;  %s3465_s5 = inlined_call_operand.vmem [shape: f32[2,32], index: 5, kind: input, shape index: {}]   ;;  %s3466_s6 = inlined_call_operand.vmem [shape: f32[1,64], index: 6, kind: input, shape index: {}]   ;;  %s3467_s7 = inlined_call_operand.hbm [shape: f32[2,16,32], index: 7, kind: output, shape index: {}]  }
   0x1   :  { %3475 = sst [smem:[#allocation26_spill]] %s3460_s0 }
   0x2   :  { %3476 = sst [smem:[#allocation27_spill]] %s3462_s2 }
   0x3   :  { %3477 = sst [smem:[#allocation28_spill]] %s3463_s3 }
   0x4   :  { %3478 = sst [smem:[#allocation29_spill]] %s3464_s4 }
   0x5   :  { %12 = vsyncpa [#allocation7], 0 }
   0x6   :  { %14 = vsyncpa [#allocation7 + $0x1], 0 }
   0x7   :  { %15 = vsyncpa [#allocation10], 0 }
   0x8   :  { %17 = vsyncpa [#allocation10 + $0x1], 0 }
   0x9   :  { %18 = vsyncpa [#allocation13], 0 }
   0xa   :  { %19 = vsyncpa [#allocation8], 0 }
   0xb   :  { %21 = vsyncpa [#allocation8 + $0x1], 0  ;;  %s2838_s24 = smov 0   ;;  %s2840_s25 = smov 0  }
   0xc   :  { %s2842_s26 = smov 0   ;;  %s2844_s27 = smov 0  }
   0xd   :  { %s2846_s28 = smov 0   ;;  %s2848_s29 = smov 0  }
   0xe LB: > { %3479 = sst [smem:[#allocation21_spill]] %s2759_s26  ;;  %s2869_s30 = sadd.s32 4294967295, %s2771_s29   ;;  %s2771_s29 = sphi %s2848_s29, %s27_s29   ;;  %s2767_s28 = sphi %s2846_s28, %s3510_s28   ;;  %s2763_s27 = sphi %s2844_s27, %s3509_s27   ;;  %s2759_s26 = sphi %s2842_s26, %s3505_s26   ;;  %s2755_s25 = sphi %s2840_s25, %s3508_s25   ;;  %s2751_s24 = sphi %s2838_s24, %s3507_s24  }
   0xf   : > { %3480 = sst [smem:[#allocation22_spill]] %s2771_s29  ;;  %s2195_s8 = sadd.s32 4294967294, %s2771_s29  }
  0x10   : > { %p59_p0 = scmp.ne.s32.totalorder %s2755_s25, %s2751_s24  ;;  %p3468_p1 = scmp.eq.s32.totalorder %s2869_s30, 0 }
  0x11   : > { %p222_p3 = scmp.eq.s32.totalorder %s2195_s8, 1  ;;  %p2196_p5 = scmp.ge.s32.totalorder %s2771_s29, 1 }
  0x12   : > { %p2878_p4 = por %p3468_p1, %p59_p0  ;;  %p229_p7 = scmp.lt.s32.totalorder %s2771_s29, 3 }
  0x13   : > { %p2883_p6 = por %p222_p3, %p59_p0  ;;  %s2773_s12 = smov [#allocation11]  }
  0x14   : > { %s3481_s9 = scalar_select %p2878_p4, 1, 0 }
  0x15   : > { %s3482_s10 = scalar_select %p2883_p6, 1, 0 }
  0x16   : > { %p2888_p8 = pnand %p2196_p5, %p229_p7  ;;  %s241_s13 = sshll.u32 %s2773_s12, 4  ;;  %s242_s13 = int_to_ptr.vmem [resolvable:$true] %s241_s13 }
  0x17   : > { %3483 = sst [smem:[#allocation23_spill]] %s3482_s10  ;;  %s2774_s15 = smov [#allocation12]  }
  0x18   : > { %p2389_p9 = pneg %p2888_p8  ;;  %s254_s16 = sshll.u32 %s2774_s15, 4  ;;  %s255_s16 = int_to_ptr.vmem [resolvable:$true] %s254_s16 }
  0x19   : > { %s2775_s17 = smov [#allocation14]   ;;  %s2556_s19 = scalar_lea.vmem %s242_s13, 256 }
  0x1a   : > { %p2897_p11 = pnand %p2389_p9, %p3468_p1  ;;  %s267_s18 = sshll.u32 %s2775_s17, 4  ;;  %s268_s18 = int_to_ptr.vmem [resolvable:$true] %s267_s18 }
  0x1b   : > { %p2557_p13 = scmp.ne.s32.totalorder %s242_s13, %s2556_s19  ;;  %p2564_p5 = scmp.lt.s32.totalorder %s242_s13, %s242_s13 }
  0x1c   : > { %p2547_p12 = pneg %p2897_p11  ;;  %p2565_p7 = scmp.lt.s32.totalorder %s2556_s19, %s2556_s19 }
  0x1e   : > { %p2559_p0 = pnand %p2557_p13, %p2547_p12  ;;  %p2566_p9 = por %p2565_p7, %p2564_p5 }
  0x20   : > { %p2560_p3 = pneg %p2559_p0 }
  0x22   : > { %p2567_p10 = pnand %p2566_p9, %p2560_p3 }
  0x24   : > { %2570 = shalt.err (!%p2567_p10)
}
  0x25   : > { %s2776_s20 = smov 64   ;;  %s2777_s21 = smov 4  }
  0x26   : > { %s3486_s2 = sld [smem:[#allocation27_spill]]  ;;  %s2582_s8 = scalar_lea.vmem %s255_s16, 128 }
  0x27   : > { %p2583_p1 = scmp.ne.s32.totalorder %s255_s16, %s2582_s8  ;;  %p2590_p2 = scmp.lt.s32.totalorder %s255_s16, %s255_s16 }
  0x28   : > { %p2591_p6 = scmp.lt.s32.totalorder %s2582_s8, %s2582_s8 }
  0x29   : > { %p2585_p13 = pnand %p2583_p1, %p2547_p12 }
  0x2a   : > { %p2592_p5 = por %p2591_p6, %p2590_p2 }
  0x2b   : > { %p2586_p0 = pneg %p2585_p13 }
  0x2c   : > { %2392 = dma.hbm_to_vmem [thread:$0]  (!%p2897_p11), %s3486_s2, 256, %s242_s13, [#allocation10], %s2776_s20, %s2776_s20, %s2777_s21  }
  0x2d   : > { %p2593_p3 = pnand %p2592_p5, %p2586_p0 }
  0x2f   : > { %2596 = shalt.err (!%p2593_p3)
}
  0x30   : > { %s3487_s3 = sld [smem:[#allocation28_spill]]  ;;  %s2608_s13 = scalar_lea.vmem %s268_s18, 256 }
  0x31   : > { %p2609_p10 = scmp.ne.s32.totalorder %s268_s18, %s2608_s13  ;;  %p2616_p9 = scmp.lt.s32.totalorder %s268_s18, %s268_s18 }
  0x32   : > { %p2617_p13 = scmp.lt.s32.totalorder %s2608_s13, %s2608_s13 }
  0x33   : > { %p2611_p7 = pnand %p2609_p10, %p2547_p12 }
  0x34   : > { %p2618_p4 = por %p2617_p13, %p2616_p9 }
  0x35   : > { %p2612_p1 = pneg %p2611_p7 }
  0x36   : > { %2395 = dma.hbm_to_vmem [thread:$0]  (!%p2897_p11), %s3487_s3, 128, %s255_s16, [#allocation13], %s2776_s20, %s2776_s20, %s2777_s21  }
  0x37   : > { %p2619_p2 = pnand %p2618_p4, %p2612_p1 }
  0x39   : > { %2622 = shalt.err (!%p2619_p2)
}
  0x3a   : > { %s3488_s4 = sld [smem:[#allocation29_spill]]  ;;  %s46_s16 = sadd.s32 1, %s2759_s26 }
  0x3b   : > { %s39_s22 = sadd.s32 1, %s2767_s28  ;;  %p53_p4 = scmp.ne.s32.totalorder %s2759_s26, %s2755_s25 }
  0x3c   : > { %p41_p6 = scmp.ge.s32.totalorder %s39_s22, 2  ;;  %p54_p12 = scmp.eq.s32.totalorder %s2771_s29, 0 }
  0x3d   : > { %p3489_p0 = scmp.eq.s32.totalorder %s2869_s30, 1  ;;  %p2413_p3 = scmp.lt.s32.totalorder %s2771_s29, 2 }
  0x3e   : > { %s3512_s22 = smov (%p41_p6, %s39_s22), 0  ;;  %p55_p10 = por %p54_p12, %p53_p4 }
  0x3f   : > { %p2934_p5 = por %p3489_p0, %p53_p4  ;;  %3491 = sst [smem:[#allocation24_spill]] %s3512_s22 }
  0x40   : > { %2398 = dma.hbm_to_vmem [thread:$0]  (!%p2897_p11), %s3488_s4, 256, %s268_s18, [#allocation13], %s2776_s20, %s2776_s20, %s2777_s21  }
  0x41   : > { %s2942_s23 = sand.u32 1, %s2759_s26   ;;  %s43_s18 = ssub.s32 %s2767_s28, %s3512_s22 }
  0x42   : > { %p44_p11 = scmp.eq.s32.totalorder %s43_s18, 0  ;;  %s2201_s20 = sshll.u32 %s2942_s23, 4 }
  0x43   : > { %s2254_s21 = sshll.u32 %s2767_s28, 8  ;;  %s3493_s0 = sld [smem:[#allocation26_spill]] }
  0x44   : > { %s2949_s8 = scalar_select %p44_p11, %s2759_s26, %s46_s16  }
  0x45   : > { %s291_s17 = scalar_lea.vmem [#allocation6], %s2201_s20  ;;  %p2956_p7 = pnand %p2413_p3, %p55_p10 }
  0x46   : > { %3492 = sst [smem:[#allocation25_spill]] %s2949_s8  ;;  %s298_s19 = sshll.u32 %s291_s17, 4  ;;  %s299_s19 = int_to_ptr.vmem [resolvable:$true] %s298_s19 }
  0x47   : > { %s308_s3 = sand.u32 1, %s2771_s29   ;;  %s288_s18 = scalar_lea.sflag [#allocation7], %s2942_s23 }
  0x48   : > { %p2625_p1 = pneg %p2956_p7  ;;  %s2636_s16 = scalar_lea.vmem %s299_s19, 256 }
  0x49   : > { %s297_s13 = scalar_lea.hbm %s3493_s0, %s2254_s21  ;;  %p2637_p9 = scmp.ne.s32.totalorder %s299_s19, %s2636_s16 }
  0x4a   : > { %s2778_s20 = smov [#allocation6]  }
  0x4b   : > { %p2639_p13 = pnand %p2637_p9, %p2625_p1  ;;  %s2641_s21 = sshll.u32 %s2778_s20, 4  ;;  %s2642_s21 = int_to_ptr.vmem [resolvable:$false] %s2641_s21 }
  0x4c   : > { %s2643_s12 = scalar_lea.vmem %s2642_s21, 512  ;;  %p2644_p4 = scmp.lt.s32.totalorder %s299_s19, %s2642_s21 }
  0x4d   : > { %p2640_p2 = pneg %p2639_p13  ;;  %p2645_p6 = scmp.lt.s32.totalorder %s2643_s12, %s2636_s16 }
  0x4f   : > { %p2646_p12 = por %p2645_p6, %p2644_p4 }
  0x51   : > { %p2647_p0 = pnand %p2646_p12, %p2640_p2 }
  0x53   : > { %2650 = shalt.err (!%p2647_p0)
}
  0x54   : > { %s2779_s15 = smov 128   ;;  %s2780_s17 = smov 8  }
  0x55   : > { %2402 = dma.hbm_to_vmem [thread:$0]  (!%p2956_p7), %s297_s13, 256, %s299_s19, %s288_s18, %s2779_s15, %s2779_s15, %s2780_s17  }
  0x56   : > { %s2204_s0 = sshll.u32 %s2942_s23, 3  ;;  %s2205_s4 = sshll.u32 %s2767_s28, 7 }
  0x57   : > { %s318_s20 = scalar_lea.hbm %s3461_s1, %s2205_s4  ;;  %s312_s26 = scalar_lea.vmem [#allocation9], %s2204_s0 }
  0x58   : > { %s320_s21 = sshll.u32 %s312_s26, 4  ;;  %s309_s16 = scalar_lea.sflag [#allocation10], %s308_s3  ;;  %s321_s21 = int_to_ptr.vmem [resolvable:$true] %s320_s21 }
  0x59   : > { %s2664_s12 = scalar_lea.vmem %s321_s21, 128  ;;  %s2781_s29 = smov [#allocation9]  }
  0x5a   : > { %p2665_p3 = scmp.ne.s32.totalorder %s321_s21, %s2664_s12  ;;  %s2669_s10 = sshll.u32 %s2781_s29, 4  ;;  %s2670_s10 = int_to_ptr.vmem [resolvable:$false] %s2669_s10 }
  0x5b   : > { %s2671_s13 = scalar_lea.vmem %s2670_s10, 256  ;;  %p2672_p9 = scmp.lt.s32.totalorder %s321_s21, %s2670_s10 }
  0x5c   : > { %p2667_p10 = pnand %p2665_p3, %p2625_p1  ;;  %p2673_p13 = scmp.lt.s32.totalorder %s2671_s13, %s2664_s12 }
  0x5e   : > { %p2668_p11 = pneg %p2667_p10  ;;  %p2674_p2 = por %p2673_p13, %p2672_p9 }
  0x60   : > { %p2675_p4 = pnand %p2674_p2, %p2668_p11 }
  0x62   : > { %2678 = shalt.err (!%p2675_p4)
}
  0x63   : > { %2405 = dma.hbm_to_vmem [thread:$0]  (!%p2956_p7), %s318_s20, 128, %s321_s21, %s309_s16  }
  0x64   : > { %329 = sbr.rel (%p2888_p8) target bundleno = 1503 (0x5df), region = 48  ;;  %s2982_s0 = sand.u32 (!%p2888_p8), 1, %s2755_s25  }
  0x65   : > { %s2207_s3 = sshll.u32 (!%p2888_p8), %s2982_s0, 4  ;;  %s332_s4 = scalar_lea.sflag (!%p2888_p8), [#allocation7], %s2982_s0 }
  0x66   : > { %s335_s26 = scalar_lea.vmem (!%p2888_p8), [#allocation6], %s2207_s3  ;;  %p3495_p1 = scmp.ne.s32.totalorder (!%p2888_p8), %s3481_s9, 0 }
  0x69   : > { %2730 = dma.done.wait (%p3495_p1), %s332_s4, 256  }
  0x6a   : > { %2732 = vsyncadd (%p3495_p1), %s332_s4, 4294967040  ;;  %s340_s2 = sand.u32 1, %s2869_s30   ;;  %s2208_s29 = sshll.u32 %s2982_s0, 3 }
  0x6b   : > { %s341_s10 = scalar_lea.sflag [#allocation10], %s340_s2  ;;  %s344_s11 = scalar_lea.vmem [#allocation9], %s2208_s29 }
  0x6c   : > { %2734 = dma.done.wait (%p3495_p1), %s341_s10, 128  }
  0x6d   : > { %2736 = vsyncadd (%p3495_p1), %s341_s10, 4294967168  ;;  %p3496_p8 = scmp.eq.s32.totalorder %s2869_s30, 0 }
  0x6f   : > { %2738 = dma.done.wait (%p3496_p8), [#allocation10], 256   ;;  %p3497_p7 = pmov %p3496_p8 }
  0x71   : > { %2740 = vsyncadd (%p3497_p7), [#allocation10], 4294967040  ;;  %p3498_p6 = pmov %p3497_p7 }
  0x73   : > { %2742 = dma.done.wait (%p3498_p6), [#allocation13], 384   ;;  %p3499_p12 = pmov %p3498_p6 }
  0x74   : > { %v2782_v0 = vmov 0.0   ;;  %vm2783_vm0 = vmmov 0   ;;  %v2490_v1 = vld [vmem:[#allocation11 + $0x8] sm:$0xff]   ;;  %v2491_v2 = vld [vmem:[#allocation12] sm:$0xff]   ;;  %vm818_vm1 = vcmask 130048   ;;  %v2492_v5 = vld [vmem:[#allocation11] sm:$0xff]   ;;  %v502_v30 = vlaneseq }
  0x75   : > { %2744 = vsyncadd (%p3499_p12), [#allocation13], 4294966912  ;;  %2285 = vmatprep.subr.bf16.mxu0 %v2782_v0  ;;  %2293 = vmatprep.subr.bf16.mxu1 %v2782_v0  ;;  %v801_v3 = vld [vmem:[%s344_s11] sm:$0xff]  ;;  %v398_v7 = vld [vmem:[%s335_s26 + $0x8] sm:$0xff]  ;;  %vm421_vm2 = vcmask 261120   ;;  %v2784_v13 = vmov 0  }
  0x76   : > { %2295 = vmatprep.mubr.msk.bf16.mxu1 %vm2783_vm0, %v2782_v0  ;;  %2289 = vmatprep.mubr.msk.bf16.mxu0 %vm2783_vm0, %v2782_v0  ;;  %v802_v4 = vpack.c.bf16 %v801_v3, %v801_v3  ;;  %v397_v6 = vld [vmem:[%s335_s26] sm:$0xff]  ;;  %s2785_s8 = smov 112   ;;  %s2786_s19 = smov 120   ;;  %vm792_vm3 = vcmask 64512   ;;  %v2792_v32 = vmov 1983009808   ;;  %v493_v38 = vpack.i.b16 %v2784_v13, %v2784_v13 }
  0x77   : > { %2286 = vmatpush3.bf16.msra.mxu0 %v2490_v1  ;;  %2294 = vmatpush3.bf16.msra.mxu1 %v2491_v2  ;;  %v399_v8 = vpack.c.bf16 %v398_v7, %v397_v6  ;;  %v2229_v9 = vld [vmem:[%s3466_s6] ss:$0 sm:$0xff]  ;;  %s2787_s18 = smov 96   ;;  %s2788_s15 = smov 104   ;;  %793 = vst.msk [vmem:[#allocation5] sm:$0xff] %vm792_vm3, %v2782_v0  ;;  %794 = vst.msk [vmem:[#allocation5 + $0x8] sm:$0xff] %vm792_vm3, %v2782_v0  ;;  %v500_v33 = vunpack.c.l.s4 %v2792_v32 }
  0x78   : > { %2287 = vmatprep.subr.bf16.mxu0 %v2782_v0  ;;  %2299 = vmatprep.subr.bf16.mxu1 %v2782_v0  ;;  %v2213_v15 = vld [vmem:[%s3465_s5] ss:$0 sm:$0xff]  ;;  %s2789_s17 = smov 88   ;;  %s2790_s20 = smov 72   ;;  %795 = vst.msk [vmem:[#allocation5 + $0x10] sm:$0xff] %vm792_vm3, %v2782_v0  ;;  %796 = vst.msk [vmem:[#allocation5 + $0x18] sm:$0xff] %vm792_vm3, %v2782_v0 }
  0x79   : > { %2488 = vset.pattern.permute.xlu1 %v2784_v13  ;;  %2489 = vset.pattern.permute.xlu0 %v2784_v13  ;;  %s2791_s21 = smov 80   ;;  %797 = vst.msk [vmem:[#allocation5 + $0x20] sm:$0xff] %vm792_vm3, %v2782_v0  ;;  %798 = vst.msk [vmem:[#allocation5 + $0x28] sm:$0xff] %vm792_vm3, %v2782_v0  ;;  %v2793_v34 = vmov 1934713408   ;;  %v503_v37 = vshrl.u32 %v502_v30, 7  ;;  %v501_v40 = vunpack.c.0.s8 %v500_v33 }
  0x7a   : > { %2296 = vmatmul.mubr.msk.bf16.vlgmr.msra.gmra.mxu1 %vm818_vm1, %v802_v4  ;;  %799 = vst.msk [vmem:[#allocation5 + $0x30] sm:$0xff] %vm792_vm3, %v2782_v0  ;;  %800 = vst.msk [vmem:[#allocation5 + $0x38] sm:$0xff] %vm792_vm3, %v2782_v0  ;;  %v531_v35 = vunpack.c.l.s4 %v2793_v34  ;;  %vm766_vm4 = vcmask 60416   ;;  %vm1542_vm5 = vcmask 1043456   ;;  %vm775_vm6 = vcmask 7168   ;;  %s2255_s13 = sshll.u32 %s2763_s27, 8 }
  0x7b   : > { %2288 = vmatpush3.bf16.msra.mxu0 %v2492_v5  ;;  %2301 = vmatprep.mubr.msk.bf16.mxu1 %vm2783_vm0, %v2782_v0  ;;  %v3059_v50 = vsub.s32 %v501_v40, %v503_v37  ;;  %784 = vst.msk [vmem:[#allocation4] sm:$0xff] %vm775_vm6, %v2782_v0  ;;  %785 = vst.msk [vmem:[#allocation4 + $0x8] sm:$0xff] %vm775_vm6, %v2782_v0  ;;  %s391_s4 = scalar_lea.vmem [#allocation15], %s2207_s3  ;;  %s3409_s10 = scalar_lea.hbm %s3467_s7, %s2255_s13 }
  0x7c   : > { %2305 = vmatprep.subr.bf16.mxu0 %v2782_v0  ;;  %v532_v44 = vunpack.c.0.s8 %v531_v35  ;;  %786 = vst.msk [vmem:[#allocation4 + $0x10] sm:$0xff] %vm775_vm6, %v2782_v0  ;;  %787 = vst.msk [vmem:[#allocation4 + $0x18] sm:$0xff] %vm775_vm6, %v2782_v0  ;;  %s2061_s26 = sshll.u32 %s391_s4, 4  ;;  %s2048_s27 = scalar_lea.sflag [#allocation8], %s2982_s0  ;;  %s3411_s26 = int_to_ptr.vmem [resolvable:$true] %s2061_s26 }
  0x7d   : > { %788 = vst.msk [vmem:[#allocation4 + $0x20] sm:$0xff] %vm775_vm6, %v2782_v0  ;;  %789 = vst.msk [vmem:[#allocation4 + $0x28] sm:$0xff] %vm775_vm6, %v2782_v0  ;;  %s2679_s3 = scalar_lea.vmem %s3411_s26, 256  ;;  %s2795_s11 = smov [#allocation15]  }
  0x7e   : > { %2290 = vmatmul.mubr.msk.bf16.vlgmr.msra.gmra.mxu0 %vm421_vm2, %v399_v8  ;;  %v3063_v55 = vsub.s32 %v532_v44, %v503_v37  ;;  %790 = vst.msk [vmem:[#allocation4 + $0x30] sm:$0xff] %vm775_vm6, %v2782_v0  ;;  %791 = vst.msk [vmem:[#allocation4 + $0x38] sm:$0xff] %vm775_vm6, %v2782_v0  ;;  %p2680_p0 = scmp.ne.s32.totalorder %s3411_s26, %s2679_s3  ;;  %s2683_s30 = sshll.u32 %s2795_s11, 4  ;;  %s2684_s30 = int_to_ptr.vmem [resolvable:$false] %s2683_s30 }
  0x7f   : > { %2307 = vmatprep.mubr.msk.bf16.mxu0 %vm2783_vm0, %v2782_v0  ;;  %s2685_s9 = scalar_lea.vmem %s2684_s30, 512  ;;  %p2686_p11 = scmp.lt.s32.totalorder %s3411_s26, %s2684_s30 }
  0x80   : > { %p2681_p3 = pnand %p2680_p0, %p2934_p5  ;;  %p2687_p9 = scmp.lt.s32.totalorder %s2685_s9, %s2679_s3 }
  0x82   : > { %p2682_p10 = pneg %p2681_p3  ;;  %p2688_p13 = por %p2687_p9, %p2686_p11 }
  0x84   : > { %p2689_p2 = pnand %p2688_p13, %p2682_p10 }
 0x13a   : > { %v856_v10 = vpop.f32.mrf.mxu1 }
 0x13b   : > { %v857_v11 = vadd.f32 %v2229_v9, %v856_v10 }
 0x13c   : > { %v2297_v12 = vpop.f32.mrf.mxu1 }
 0x13d   : > { %v3025_v14 = vpack.c.bf16 %v857_v11, %v857_v11 }
 0x13e   : > { %v459_v16 = vpop.f32.mrf.mxu0  ;;  %v859_v17 = vpop.f32.mrf.mxu1 }
 0x13f   : > { %867 = vrot.lane.b32.xlu0 %v3025_v14, %s2785_s8  ;;  %864 = vrot.lane.b32.xlu1 %v3025_v14, %s2786_s19  ;;  %v460_v19 = vadd.f32 %v2213_v15, %v459_v16 }
 0x140   : > { %v2291_v18 = vpop.f32.mrf.mxu0  ;;  %v2298_v20 = vpop.f32.mrf.mxu1 }
 0x141   : > { %v466_v24 = vmul.f32 0.35355338, %v460_v19 }
 0x142   : > { %v462_v21 = vpop.f32.mrf.mxu0 }
 0x143   : > { %v463_v22 = vadd.f32 %v2213_v15, %v462_v21  ;;  %873 = vrot.lane.b32.xlu0 %v3025_v14, %s2787_s18  ;;  %870 = vrot.lane.b32.xlu1 %v3025_v14, %s2788_s15 }
 0x144   : > { %v2292_v23 = vpop.f32.mrf.mxu0 }
 0x145   : > { %v467_v25 = vmul.f32 0.35355338, %v463_v22 }
 0x147   : > { %v468_v26 = vpack.c.bf16 %v467_v25, %v466_v24  ;;  %876 = vrot.lane.b32.xlu1 %v3025_v14, %s2789_s17 }
 0x149   : > { %470 = vrot.lane.b32.xlu0 %v468_v26, %s2786_s19  ;;  %v480_v42 = vshrl.u32 %v468_v26, 16 }
 0x14b   : > { %474 = vrot.lane.b32.xlu1 %v468_v26, %s2788_s15 }
 0x14d   : > { %472 = vrot.lane.b32.xlu0 %v468_v26, %s2785_s8 }
 0x14f   : > { %882 = vrot.lane.b32.xlu1 %v3025_v14, %s2790_s20 }
 0x151   : > { %879 = vrot.lane.b32.xlu0 %v3025_v14, %s2791_s21 }
 0x1b1   : > { %v3053_v27 = vpop.permute.xlu0 %867  ;;  %v865_v28 = vpop.permute.xlu1 %864 }
 0x1b5   : > { %v871_v29 = vpop.permute.xlu1 %870  ;;  %v3055_v31 = vpop.permute.xlu0 %873 }
 0x1b6   : > { %v885_v53 = vcombine.low %v3025_v14, %v3055_v31 }
 0x1b9   : > { %v877_v36 = vpop.permute.xlu1 %876 }
 0x1ba   : > { %v919_v45 = vcombine.low %v865_v28, %v877_v36 }
 0x1bb   : > { %v471_v39 = vpop.permute.xlu0 %470 }
 0x1bc   : > { %v478_v41 = vpack.i.b16 %v471_v39, %v468_v26  ;;  %v481_v43 = vshrl.u32 %v471_v39, 16  ;;  %v926_v57 = vrot.slane %v919_v45, %v3059_v50  ;;  %v892_v45 = vrot.slane %v885_v53, %v3059_v50 }
 0x1bd   : > { %v475_v47 = vpop.permute.xlu1 %474 }
 0x1be   : > { %v482_v46 = vpack.i.b16 %v481_v43, %v480_v42  ;;  %v498_v48 = vcombine.high %v478_v41, %v493_v38  ;;  %v489_v54 = vshrl.u32 %v475_v47, 16  ;;  %v505_v58 = vrot.slane %v478_v41, %v3059_v50 }
 0x1bf   : > { %v473_v49 = vpop.permute.xlu0 %472 }
 0x1c0   : > { %v564_v51 = vcombine.high %v482_v46, %v493_v38  ;;  %v486_v52 = vpack.i.b16 %v475_v47, %v473_v49  ;;  %v488_v56 = vshrl.u32 %v473_v49, 16  ;;  %v512_v62 = vrot.slane %v498_v48, %v3059_v50 }
 0x1c1   : > { %v883_v61 = vpop.permute.xlu1 %882  ;;  %v571_v63 = vrot.slane %v482_v46, %v3059_v50 }
 0x1c2   : > { %v513_v59 = vcombine.high %v486_v52, %v493_v38  ;;  %v520_v60 = vrot.slane %v486_v52, %v3059_v50  ;;  %v490_v1 = vpack.i.b16 %v489_v54, %v488_v56  ;;  %v927_v2 = vcombine.low %v871_v29, %v883_v61 }
 0x1c3   : > { %v880_v3 = vpop.permute.xlu0 %879  ;;  %v578_v4 = vrot.slane %v564_v51, %v3059_v50 }
 0x1c4   : > { %v527_v5 = vrot.slane %v513_v59, %v3059_v50  ;;  %v528_v6 = vcombine.low %v505_v58, %v520_v60  ;;  %v529_v7 = vcombine.high %v505_v58, %v520_v60  ;;  %v579_v8 = vcombine.high %v490_v1, %v493_v38 }
 0x1c5   : > { %v586_v9 = vrot.slane %v490_v1, %v3059_v50  ;;  %v934_v10 = vrot.slane %v927_v2, %v3059_v50  ;;  %v893_v11 = vcombine.low %v3053_v27, %v880_v3 }
 0x1c6   : > { %v536_v12 = vrot.slane %v528_v6, %v3063_v55  ;;  %v543_v14 = vrot.slane %v529_v7, %v3063_v55  ;;  %v544_v15 = vcombine.low %v512_v62, %v527_v5  ;;  %v545_v16 = vcombine.high %v512_v62, %v527_v5 }
 0x1c7   : > { %v593_v17 = vrot.slane %v579_v8, %v3059_v50  ;;  %v594_v18 = vcombine.low %v571_v63, %v586_v9  ;;  %v595_v19 = vcombine.high %v571_v63, %v586_v9  ;;  %v935_v20 = vcombine.low %v926_v57, %v934_v10 }
 0x1c8   : > { %v552_v21 = vrot.slane %v544_v15, %v3063_v55  ;;  %v559_v22 = vrot.slane %v545_v16, %v3063_v55  ;;  %v630_v23 = vcombine.low %v536_v12, %v543_v14  ;;  %v2217_v24 = vcombine.high %v536_v12, %v543_v14 }
 0x1c9   : > { %v602_v25 = vrot.slane %v594_v18, %v3063_v55  ;;  %v609_v26 = vrot.slane %v595_v19, %v3063_v55  ;;  %v610_v27 = vcombine.low %v578_v4, %v593_v17  ;;  %v611_v28 = vcombine.high %v578_v4, %v593_v17 }
 0x1ca   : > { %v637_v29 = vrot.slane %v630_v23, %v3059_v50  ;;  %v645_v30 = vrot.slane %v2217_v24, %v3059_v50  ;;  %v646_v31 = vcombine.low %v552_v21, %v559_v22  ;;  %v2218_v32 = vcombine.high %v552_v21, %v559_v22 }
 0x1cb   : > { %v618_v33 = vrot.slane %v610_v27, %v3063_v55  ;;  %v625_v34 = vrot.slane %v611_v28, %v3063_v55  ;;  %v680_v35 = vcombine.low %v602_v25, %v609_v26  ;;  %v2219_v36 = vcombine.high %v602_v25, %v609_v26 }
 0x1cc   : > { %v653_v37 = vrot.slane %v646_v31, %v3059_v50  ;;  %v661_v38 = vrot.slane %v2218_v32, %v3059_v50  ;;  %v662_v39 = vcombine.low %v637_v29, %v645_v30  ;;  %v936_v40 = vcombine.high %v926_v57, %v934_v10 }
 0x1cd   : > { %v687_v41 = vrot.slane %v680_v35, %v3059_v50  ;;  %v695_v42 = vrot.slane %v2219_v36, %v3059_v50  ;;  %v696_v43 = vcombine.low %v618_v33, %v625_v34  ;;  %v2220_v44 = vcombine.high %v618_v33, %v625_v34 }
 0x1ce   : > { %v670_v46 = vcombine.low %v653_v37, %v661_v38  ;;  %v943_v47 = vrot.slane %v935_v20, %v3063_v55  ;;  %v3093_v48 = vrot.slane %v936_v40, %v3063_v55  ;;  %v900_v54 = vrot.slane %v893_v11, %v3059_v50 }
 0x1cf   : > { %v703_v49 = vrot.slane %v696_v43, %v3059_v50  ;;  %v711_v51 = vrot.slane %v2220_v44, %v3059_v50  ;;  %v712_v52 = vcombine.low %v687_v41, %v695_v42  ;;  %v669_v56 = vrot.slane %v662_v39, %v3063_v55 }
 0x1d0   : > { %v677_v57 = vrot.slane %v670_v46, %v3063_v55  ;;  %v951_v58 = vcombine.high %v943_v47, %v2784_v13  ;;  %v952_v53 = vcombine.high %v3093_v48, %v2784_v13  ;;  %v901_v60 = vcombine.low %v892_v45, %v900_v54 }
 0x1d1   : > { %v720_v59 = vcombine.low %v703_v49, %v711_v51  ;;  %v719_v63 = vrot.slane %v712_v52, %v3063_v55  ;;  %v902_v2 = vcombine.high %v892_v45, %v900_v54  ;;  %v958_v4 = vshrl.u32 %v943_v47, 16 }
 0x1d2   : > { %v678_v61 = vcombine.low %v669_v56, %v677_v57  ;;  %v679_v62 = vcombine.high %v669_v56, %v677_v57  ;;  %v909_v3 = vrot.slane %v901_v60, %v3063_v55  ;;  %v966_v5 = vshrl.u32 %v951_v58, 16 }
 0x1d3   : > { %v727_v1 = vrot.slane %v720_v59, %v3063_v55  ;;  %v974_v6 = vshrl.u32 %v3093_v48, 16  ;;  %v982_v7 = vshrl.u32 %v952_v53, 16  ;;  %v916_v10 = vrot.slane %v902_v2, %v3063_v55 }
 0x1d4   : > { %v917_v11 = vcombine.high %v909_v3, %v2784_v13  ;;  %v733_v12 = vshrl.u32 %v678_v61, 16  ;;  %v739_v14 = vshrl.u32 %v679_v62, 16  ;;  %v955_v15 = vpack.i.b16 %v943_v47, %v909_v3 }
 0x1d5   : > { %v728_v8 = vcombine.low %v719_v63, %v727_v1  ;;  %v729_v9 = vcombine.high %v719_v63, %v727_v1  ;;  %v957_v16 = vshrl.u32 %v909_v3, 16  ;;  %v918_v21 = vcombine.high %v916_v10, %v2784_v13 }
 0x1d6   : > { %v963_v23 = vpack.i.b16 %v951_v58, %v917_v11  ;;  %v965_v24 = vshrl.u32 %v917_v11, 16  ;;  %v971_v32 = vpack.i.b16 %v3093_v48, %v916_v10  ;;  %v973_v37 = vshrl.u32 %v916_v10, 16 }
 0x1d7   : > { %v732_v17 = vpack.i.b16 %v728_v8, %v678_v61  ;;  %v734_v18 = vshrl.u32 %v728_v8, 16  ;;  %v738_v19 = vpack.i.b16 %v729_v9, %v679_v62  ;;  %v740_v20 = vshrl.u32 %v729_v9, 16 }
 0x1d8   : > { %v959_v22 = vpack.i.b16 %v958_v4, %v957_v16  ;;  %v967_v31 = vpack.i.b16 %v966_v5, %v965_v24  ;;  %v979_v38 = vpack.i.b16 %v952_v53, %v918_v21  ;;  %v981_v39 = vshrl.u32 %v918_v21, 16 }
 0x1d9   : > { %v735_v25 = vpack.i.b16 %v734_v18, %v733_v12  ;;  %v741_v26 = vpack.i.b16 %v740_v20, %v739_v14  ;;  %v2221_v27 = vcombine.low %v732_v17, %v732_v17  ;;  %v2222_v28 = vcombine.high %v732_v17, %v732_v17 }
 0x1da   : > { %v2225_v29 = vcombine.low %v738_v19, %v738_v19  ;;  %v2226_v30 = vcombine.high %v738_v19, %v738_v19  ;;  %v985_v40 = vcombine.low %v955_v15, %v971_v32  ;;  %v975_v41 = vpack.i.b16 %v974_v6, %v973_v37 }
 0x1db   : > { %v2223_v33 = vcombine.low %v735_v25, %v735_v25  ;;  %v2224_v34 = vcombine.high %v735_v25, %v735_v25  ;;  %v2227_v35 = vcombine.low %v741_v26, %v741_v26  ;;  %v2228_v36 = vcombine.high %v741_v26, %v741_v26  ;;  %767 = vst.msk [vmem:[#allocation2] sm:$0xf] %vm766_vm4, %v2221_v27 }
 0x1dc   : > { %768 = vst.msk [vmem:[#allocation2 + $0x4] sm:$0xf] %vm766_vm4, %v2222_v28  ;;  %771 = vst.msk [vmem:[#allocation2 + $0x10] sm:$0xf] %vm766_vm4, %v2225_v29  ;;  %v983_v42 = vpack.i.b16 %v982_v7, %v981_v39  ;;  %v993_v43 = vcombine.low %v963_v23, %v979_v38  ;;  %v1019_v44 = vcombine.low %v959_v22, %v975_v41  ;;  %v2794_v25 = vmov -inf  }
 0x1dd   : > { %772 = vst.msk [vmem:[#allocation2 + $0x14] sm:$0xf] %vm766_vm4, %v2226_v30  ;;  %769 = vst.msk [vmem:[#allocation2 + $0x8] sm:$0xf] %vm766_vm4, %v2223_v33  ;;  %v992_v45 = vrot.slane %v985_v40, %v3059_v50 }
 0x1de   : > { %770 = vst.msk [vmem:[#allocation2 + $0xc] sm:$0xf] %vm766_vm4, %v2224_v34  ;;  %773 = vst.msk [vmem:[#allocation2 + $0x18] sm:$0xf] %vm766_vm4, %v2227_v35  ;;  %v1000_v46 = vrot.slane %v993_v43, %v3059_v50  ;;  %v1027_v47 = vcombine.low %v967_v31, %v983_v42  ;;  %v1026_v49 = vrot.slane %v1019_v44, %v3059_v50 }
 0x1df   : > { %774 = vst.msk [vmem:[#allocation2 + $0x1c] sm:$0xf] %vm766_vm4, %v2228_v36 }
 0x1e0   : > { %v1001_v48 = vcombine.low %v992_v45, %v1000_v46  ;;  %v1034_v51 = vrot.slane %v1027_v47, %v3059_v50  ;;  %v1002_v52 = vcombine.high %v992_v45, %v1000_v46  ;;  %776 = vst.msk [vmem:[#allocation3] sm:$0xff] %vm775_vm6, %v2794_v25  ;;  %777 = vst.msk [vmem:[#allocation3 + $0x8] sm:$0xff] %vm775_vm6, %v2794_v25 }
 0x1e1   : > { %778 = vst.msk [vmem:[#allocation3 + $0x10] sm:$0xff] %vm775_vm6, %v2794_v25  ;;  %779 = vst.msk [vmem:[#allocation3 + $0x18] sm:$0xff] %vm775_vm6, %v2794_v25 }
 0x1e2   : > { %v1009_v54 = vrot.slane %v1001_v48, %v3063_v55  ;;  %v1035_v56 = vcombine.low %v1026_v49, %v1034_v51  ;;  %v1016_v57 = vrot.slane %v1002_v52, %v3063_v55  ;;  %v1036_v58 = vcombine.high %v1026_v49, %v1034_v51  ;;  %780 = vst.msk [vmem:[#allocation3 + $0x20] sm:$0xff] %vm775_vm6, %v2794_v25 }
 0x1e3   : > { %v2493_v10 = vld [vmem:[#allocation2] sm:$0xff]   ;;  %781 = vst.msk [vmem:[#allocation3 + $0x28] sm:$0xff] %vm775_vm6, %v2794_v25  ;;  %782 = vst.msk [vmem:[#allocation3 + $0x30] sm:$0xff] %vm775_vm6, %v2794_v25 }
 0x1e4   : > { %v1043_v53 = vrot.slane %v1035_v56, %v3063_v55  ;;  %v1050_v59 = vrot.slane %v1036_v58, %v3063_v55  ;;  %v3128_v60 = vcombine.high %v1016_v57, %v2784_v13  ;;  %v1056_v62 = vshrl.u32 %v1009_v54, 16  ;;  %v2495_v20 = vld [vmem:[#allocation2 + $0x10] sm:$0xff]   ;;  %783 = vst.msk [vmem:[#allocation3 + $0x38] sm:$0xff] %vm775_vm6, %v2794_v25 }
 0x1e5   : > { %v1017_v4 = vcombine.high %v1009_v54, %v2784_v13  ;;  %v2494_v12 = vld [vmem:[#allocation2 + $0x8] sm:$0xff]   ;;  %v1068_v19 = vshrl.u32 %v1016_v57, 16 }
 0x1e6   : > { %v1055_v61 = vpack.i.b16 %v1043_v53, %v1009_v54  ;;  %v1057_v63 = vshrl.u32 %v1043_v53, 16  ;;  %v1051_v1 = vcombine.high %v1043_v53, %v2784_v13  ;;  %v3132_v50 = vcombine.high %v1050_v59, %v2784_v13  ;;  %v2496_v23 = vld [vmem:[#allocation2 + $0x18] sm:$0xff]  }
 0x1e7   : > { %v1074_v5 = vshrl.u32 %v3128_v60, 16  ;;  %v1062_v13 = vshrl.u32 %v1017_v4, 16  ;;  %v1069_v17 = vshrl.u32 %v1050_v59, 16  ;;  %v1067_v18 = vpack.i.b16 %v1050_v59, %v1016_v57  ;;  %v3221_v51 = vld [vmem:[#allocation3] sm:$0xff]  ;;  %v3226_v56 = vld [vmem:[#allocation3 + $0x8] sm:$0xff] }
 0x1e8   : > { %v1095_v2 = vsel %vm792_vm3, %v1055_v61, 0  ;;  %v1058_v3 = vpack.i.b16 %v1057_v63, %v1056_v62  ;;  %v1073_v55 = vpack.i.b16 %v3132_v50, %v3128_v60  ;;  %v1075_v6 = vshrl.u32 %v3132_v50, 16  ;;  %v3228_v57 = vld [vmem:[#allocation3 + $0x10] sm:$0xff] }
 0x1e9   : > { %2300 = vmatpush3.bf16.xpose.msra.mxu1 %v1095_v2  ;;  %v1063_v8 = vshrl.u32 %v1051_v1, 16  ;;  %v1061_v11 = vpack.i.b16 %v1051_v1, %v1017_v4  ;;  %v1070_v21 = vpack.i.b16 %v1069_v17, %v1068_v19  ;;  %v1544_v22 = vsel %vm1542_vm5, %v1067_v18, 0  ;;  %v3241_v63 = vld [vmem:[#allocation3 + $0x20] sm:$0xff]  ;;  %v3243_v1 = vld [vmem:[#allocation3 + $0x18] sm:$0xff] }
 0x1ea   : > { %v1147_v7 = vsel %vm792_vm3, %v1058_v3, 0  ;;  %2311 = vmatprep.subr.bf16.mxu1 %v2782_v0  ;;  %v3142_v9 = vpack.i.b16 %v1075_v6, %v1074_v5 }
 0x1eb   : > { %2306 = vmatpush3.bf16.xpose.msra.mxu0 %v1147_v7  ;;  %v1064_v14 = vpack.i.b16 %v1063_v8, %v1062_v13  ;;  %v1199_v15 = vsel %vm792_vm3, %v1061_v11, 0  ;;  %v1591_v24 = vsel %vm1542_vm5, %v1070_v21, 0  ;;  %v3261_v8 = vld [vmem:[#allocation3 + $0x28] sm:$0xff]  ;;  %v3280_v17 = vld [vmem:[#allocation3 + $0x38] sm:$0xff] }
 0x1ec   : > { %2317 = vmatprep.subr.bf16.mxu0 %v2782_v0 }
 0x1ed   : > { %v1251_v16 = vsel %vm792_vm3, %v1064_v14, 0 }
 0x1f0   : > { %2302 = vmatmul.mubr.msk.bf16.vlgmr.msra.gmra.mxu1 %vm792_vm3, %v2493_v10  ;;  %v3263_v10 = vld [vmem:[#allocation3 + $0x30] sm:$0xff] }
 0x1f1   : > { %2312 = vmatpush3.bf16.xpose.msra.mxu1 %v1199_v15  ;;  %2313 = vmatprep.mubr.msk.bf16.mxu1 %vm2783_vm0, %v2782_v0 }
 0x1f2   : > { %2308 = vmatmul.mubr.msk.bf16.vlgmr.msra.gmra.mxu0 %vm792_vm3, %v2494_v12  ;;  %2323 = vmatprep.subr.bf16.mxu1 %v2782_v0 }
 0x1f3   : > { %2318 = vmatpush3.bf16.xpose.msra.mxu0 %v1251_v16  ;;  %2319 = vmatprep.mubr.msk.bf16.mxu0 %vm2783_vm0, %v2782_v0 }
 0x1f4   : > { %2329 = vmatprep.subr.bf16.mxu0 %v2782_v0 }
 0x1f8   : > { %2314 = vmatmul.mubr.msk.bf16.vlgmr.msra.gmra.mxu1 %vm792_vm3, %v2495_v20 }
 0x1f9   : > { %2324 = vmatpush3.bf16.msra.mxu1 %v1544_v22  ;;  %2325 = vmatprep.mubr.msk.bf16.mxu1 %vm2783_vm0, %v2782_v0 }
 0x1fa   : > { %2320 = vmatmul.mubr.msk.bf16.vlgmr.msra.gmra.mxu0 %vm792_vm3, %v2496_v23  ;;  %2335 = vmatprep.subr.bf16.mxu1 %v2782_v0 }
 0x1fb   : > { %2330 = vmatpush3.bf16.msra.mxu0 %v1591_v24  ;;  %2331 = vmatprep.mubr.msk.bf16.mxu0 %vm2783_vm0, %v2782_v0 }
 0x1fc   : > { %2341 = vmatprep.subr.bf16.mxu0 %v2782_v0 }
 0x2b0   : > { %v3189_v26 = vpop.f32.mrf.mxu1 }
 0x2b1   : > { %v1302_v27 = vsel %vm792_vm3, %v3189_v26, -inf }
 0x2b2   : > { %1303 = vmax.xlane.f32.xlu0 %v1302_v27  ;;  %v2303_v28 = vpop.f32.mrf.mxu1  ;;  %v3193_v29 = vpop.f32.mrf.mxu0 }
 0x2b3   : > { %v1308_v33 = vsel %vm792_vm3, %v3193_v29, -inf }
 0x2b4   : > { %v3195_v30 = vpop.f32.mrf.mxu1  ;;  %v2309_v31 = vpop.f32.mrf.mxu0 }
 0x2b5   : > { %v1305_v32 = vsel %vm792_vm3, %v3195_v30, -inf }
 0x2b6   : > { %1306 = vmax.xlane.f32.xlu1 %v1305_v32  ;;  %v2304_v34 = vpop.f32.mrf.mxu1  ;;  %1309 = vmax.xlane.f32.xlu0 %v1308_v33  ;;  %v3201_v35 = vpop.f32.mrf.mxu0 }
 0x2b7   : > { %v1311_v39 = vsel %vm792_vm3, %v3201_v35, -inf }
 0x2b8   : > { %v2310_v36 = vpop.f32.mrf.mxu0  ;;  %v3203_v37 = vpop.f32.mrf.mxu1 }
 0x2b9   : > { %v1314_v38 = vsel %vm792_vm3, %v3203_v37, -inf }
 0x2ba   : > { %1315 = vmax.xlane.f32.xlu1 %v1314_v38  ;;  %v2315_v40 = vpop.f32.mrf.mxu1  ;;  %1312 = vmax.xlane.f32.xlu0 %v1311_v39  ;;  %v3209_v41 = vpop.f32.mrf.mxu0 }
 0x2bb   : > { %v1320_v45 = vsel %vm792_vm3, %v3209_v41, -inf }
 0x2bc   : > { %v3211_v42 = vpop.f32.mrf.mxu1  ;;  %v2321_v43 = vpop.f32.mrf.mxu0 }
 0x2bd   : > { %v1317_v44 = vsel %vm792_vm3, %v3211_v42, -inf }
 0x2be   : > { %v2316_v46 = vpop.f32.mrf.mxu1  ;;  %1318 = vmax.xlane.f32.xlu0 %v1317_v44  ;;  %1321 = vmax.xlane.f32.xlu1 %v1320_v45  ;;  %v3217_v47 = vpop.f32.mrf.mxu0 }
 0x2bf   : > { %v1323_v49 = vsel %vm792_vm3, %v3217_v47, -inf }
 0x2c0   : > { %v2322_v48 = vpop.f32.mrf.mxu0 }
 0x2c2   : > { %1324 = vmax.xlane.f32.xlu0 %v1323_v49 }
 0x33b   : > { %v1304_v52 = vpop.xlane.xlu0 %1303 }
 0x33c   : > { %v3224_v54 = vmax.f32 %v3221_v51, %v1304_v52 }
 0x33e   : > { %v1334_v58 = vsub.f32 %v3221_v51, %v3224_v54  ;;  %1744 = vst.msk [vmem:[#allocation3] sm:$0xff] %vm775_vm6, %v3224_v54  ;;  %1360 = vperm.xlu1 %2488, %v3224_v54  }
 0x33f   : > { %v1307_v53 = vpop.xlane.xlu1 %1306  ;;  %v1310_v59 = vpop.xlane.xlu0 %1309 }
 0x340   : > { %v3236_v61 = vmax.f32 %v3226_v56, %v1307_v53  ;;  %v3239_v62 = vmax.f32 %v3228_v57, %v1310_v59 }
 0x342   : > { %v1335_v2 = vsub.f32 %v3226_v56, %v3236_v61  ;;  %1745 = vst.msk [vmem:[#allocation3 + $0x8] sm:$0xff] %vm775_vm6, %v3236_v61  ;;  %v1336_v3 = vsub.f32 %v3228_v57, %v3239_v62  ;;  %1746 = vst.msk [vmem:[#allocation3 + $0x10] sm:$0xff] %vm775_vm6, %v3239_v62  ;;  %1370 = vperm.xlu1 %2488, %v3239_v62   ;;  %1365 = vperm.xlu0 %2489, %v3236_v61  }
 0x343   : > { %v1316_v4 = vpop.xlane.xlu1 %1315  ;;  %v1313_v5 = vpop.xlane.xlu0 %1312 }
 0x344   : > { %v3256_v6 = vmax.f32 %v3241_v63, %v1316_v4  ;;  %v3259_v7 = vmax.f32 %v3243_v1, %v1313_v5  ;;  %v1344_v62 = vmul.f32 1.442695, %v1335_v2 }
 0x346   : > { %v1338_v11 = vsub.f32 %v3241_v63, %v3256_v6  ;;  %1748 = vst.msk [vmem:[#allocation3 + $0x20] sm:$0xff] %vm775_vm6, %v3256_v6  ;;  %v1337_v13 = vsub.f32 %v3243_v1, %v3259_v7  ;;  %1747 = vst.msk [vmem:[#allocation3 + $0x18] sm:$0xff] %vm775_vm6, %v3259_v7  ;;  %1375 = vperm.xlu1 %2488, %v3259_v7  }
 0x347   : > { %v1319_v12 = vpop.xlane.xlu0 %1318  ;;  %v1322_v14 = vpop.xlane.xlu1 %1321 }
 0x348   : > { %v3275_v15 = vmax.f32 %v3261_v8, %v1319_v12  ;;  %v3278_v16 = vmax.f32 %v3263_v10, %v1322_v14  ;;  %v1348_v51 = vmul.f32 1.442695, %v1337_v13  ;;  %v1350_v7 = vmul.f32 1.442695, %v1338_v11 }
 0x34a   : > { %v1339_v18 = vsub.f32 %v3261_v8, %v3275_v15  ;;  %1749 = vst.msk [vmem:[#allocation3 + $0x28] sm:$0xff] %vm775_vm6, %v3275_v15  ;;  %v1340_v19 = vsub.f32 %v3263_v10, %v3278_v16  ;;  %1750 = vst.msk [vmem:[#allocation3 + $0x30] sm:$0xff] %vm775_vm6, %v3278_v16  ;;  %1380 = vperm.xlu1 %2488, %v3256_v6   ;;  %v1422_v6 = vld [vmem:[#allocation4] sm:$0xff] }
 0x34b   : > { %v1325_v20 = vpop.xlane.xlu0 %1324 }
 0x34c   : > { %v3292_v21 = vmax.f32 %v3280_v17, %v1325_v20  ;;  %v1352_v57 = vmul.f32 1.442695, %v1339_v18  ;;  %v1354_v56 = vmul.f32 1.442695, %v1340_v19 }
 0x34e   : > { %v1341_v22 = vsub.f32 %v3280_v17, %v3292_v21  ;;  %1751 = vst.msk [vmem:[#allocation3 + $0x38] sm:$0xff] %vm775_vm6, %v3292_v21  ;;  %1390 = vperm.xlu1 %2488, %v3278_v16   ;;  %v1423_v16 = vld [vmem:[#allocation4 + $0x8] sm:$0xff] }
 0x350   : > { %v1356_v1 = vmul.f32 1.442695, %v1341_v22 }
 0x352   : > { %1385 = vperm.xlu1 %2488, %v3275_v15  }
 0x356   : > { %1395 = vperm.xlu1 %2488, %v3292_v21   ;;  %v1424_v21 = vld [vmem:[#allocation4 + $0x10] sm:$0xff] }
 0x3b9   : > { %v1361_v23 = vpop.permute.xlu1 %1360 }
 0x3ba   : > { %v1398_v24 = vsub.f32 %v3189_v26, %v1361_v23 }
 0x3bc   : > { %v1406_v25 = vmul.f32 1.442695, %v1398_v24  ;;  %v1342_v24 = vmul.f32 1.442695, %v1334_v58 }
 0x3bd   : > { %v1371_v27 = vpop.permute.xlu1 %1370  ;;  %v1366_v28 = vpop.permute.xlu0 %1365 }
 0x3be   : > { %2497 = vpow2.f32 %v1406_v25  ;;  %v1400_v31 = vsub.f32 %v3193_v29, %v1371_v27  ;;  %v1399_v32 = vsub.f32 %v3195_v30, %v1366_v28 }
 0x3c0   : > { %v1410_v33 = vmul.f32 1.442695, %v1400_v31  ;;  %v1408_v34 = vmul.f32 1.442695, %v1399_v32 }
 0x3c1   : > { %v1376_v36 = vpop.permute.xlu1 %1375 }
 0x3c2   : > { %2499 = vpow2.f32 %v1410_v33  ;;  %v1401_v38 = vsub.f32 %v3201_v35, %v1376_v36 }
 0x3c3   : > { %2501 = vpow2.f32 %v1408_v34 }
 0x3c4   : > { %v1412_v39 = vmul.f32 1.442695, %v1401_v38  ;;  %v1425_v38 = vld [vmem:[#allocation4 + $0x18] sm:$0xff] }
 0x3c5   : > { %v1381_v40 = vpop.permute.xlu1 %1380 }
 0x3c6   : > { %2503 = vpow2.f32 %v1412_v39  ;;  %v1402_v26 = vsub.f32 %v3203_v37, %v1381_v40 }
 0x3c8   : > { %v1414_v43 = vmul.f32 1.442695, %v1402_v26  ;;  %v1426_v26 = vld [vmem:[#allocation4 + $0x20] sm:$0xff] }
 0x3c9   : > { %v1391_v44 = vpop.permute.xlu1 %1390 }
 0x3ca   : > { %2505 = vpow2.f32 %v1414_v43  ;;  %v1404_v45 = vsub.f32 %v3209_v41, %v1391_v44 }
 0x3cb   : > { %v2498_v29 = vpop.eup %2497 }
 0x3cc   : > { %v1418_v46 = vmul.f32 1.442695, %v1404_v45  ;;  %v1438_v30 = vsel %vm792_vm3, %v2498_v29, 0.0 }
 0x3cd   : > { %v1386_v48 = vpop.permute.xlu1 %1385  ;;  %1439 = vadd.xlane.f32.xlu1 %v1438_v30  ;;  %v1428_v30 = vld [vmem:[#allocation4 + $0x30] sm:$0xff] }
 0x3ce   : > { %2507 = vpow2.f32 %v1418_v46  ;;  %v1403_v35 = vsub.f32 %v3211_v42, %v1386_v48  ;;  %v1638_v42 = vsel %vm1542_vm5, %v1073_v55, 0 }
 0x3cf   : > { %v2500_v49 = vpop.eup %2499 }
 0x3d0   : > { %v2502_v52 = vpop.eup %2501  ;;  %v1416_v53 = vmul.f32 1.442695, %v1403_v35  ;;  %v1444_v59 = vsel %vm792_vm3, %v2500_v49, 0.0 }
 0x3d1   : > { %1445 = vadd.xlane.f32.xlu1 %v1444_v59  ;;  %v1396_v37 = vpop.permute.xlu1 %1395  ;;  %v1441_v4 = vsel %vm792_vm3, %v2502_v52, 0.0  ;;  %v1535_v5 = vpack.c.bf16 %v2502_v52, %v2498_v29  ;;  %v1427_v59 = vld [vmem:[#allocation4 + $0x28] sm:$0xff] }
 0x3d2   : > { %2509 = vpow2.f32 %v1416_v53  ;;  %v1405_v41 = vsub.f32 %v3217_v47, %v1396_v37  ;;  %1442 = vadd.xlane.f32.xlu0 %v1441_v4  ;;  %v1685_v47 = vsel %vm1542_vm5, %v3142_v9, 0  ;;  %v1346_v9 = vmul.f32 1.442695, %v1336_v3 }
 0x3d3   : > { %v2504_v12 = vpop.eup %2503  ;;  %2326 = vmatmul.mubr.msk.bf16.vlgmr.msra.gmra.mxu1 %vm792_vm3, %v1535_v5 }
 0x3d4   : > { %v1420_v14 = vmul.f32 1.442695, %v1405_v41  ;;  %2336 = vmatpush3.bf16.msra.mxu1 %v1638_v42  ;;  %v1447_v20 = vsel %vm792_vm3, %v2504_v12, 0.0  ;;  %v1536_v23 = vpack.c.bf16 %v2504_v12, %v2500_v49  ;;  %2337 = vmatprep.mubr.msk.bf16.mxu1 %vm2783_vm0, %v2782_v0  ;;  %v1429_v12 = vld [vmem:[#allocation4 + $0x38] sm:$0xff] }
 0x3d5   : > { %2347 = vmatprep.subr.bf16.mxu1 %v2782_v0 }
 0x3d6   : > { %2511 = vpow2.f32 %v1420_v14  ;;  %1448 = vadd.xlane.f32.xlu0 %v1447_v20  ;;  %2332 = vmatmul.mubr.msk.bf16.vlgmr.msra.gmra.mxu0 %vm792_vm3, %v1536_v23 }
 0x3d7   : > { %v2506_v60 = vpop.eup %2505  ;;  %2342 = vmatpush3.bf16.msra.mxu0 %v1685_v47  ;;  %2343 = vmatprep.mubr.msk.bf16.mxu0 %vm2783_vm0, %v2782_v0  ;;  %2513 = vpow2.f32 %v1342_v24 }
 0x3d8   : > { %v1450_v50 = vsel %vm792_vm3, %v2506_v60, 0.0  ;;  %2353 = vmatprep.subr.bf16.mxu0 %v2782_v0  ;;  %2515 = vpow2.f32 %v1346_v9 }
 0x3d9   : > { %1451 = vadd.xlane.f32.xlu1 %v1450_v50  ;;  %2517 = vpow2.f32 %v1348_v51 }
 0x3da   : > { %2519 = vpow2.f32 %v1352_v57 }
 0x3db   : > { %v2508_v55 = vpop.eup %2507  ;;  %2521 = vpow2.f32 %v1344_v62 }
 0x3dc   : > { %v1456_v25 = vsel %vm792_vm3, %v2508_v55, 0.0  ;;  %2523 = vpow2.f32 %v1356_v1 }
 0x3dd   : > { %1457 = vadd.xlane.f32.xlu1 %v1456_v25  ;;  %2525 = vpow2.f32 %v1350_v7 }
 0x3de   : > { %2527 = vpow2.f32 %v1354_v56  ;;  %v1481_v56 = vld [vmem:[#allocation5 + $0x10] sm:$0xff] }
 0x3df   : > { %v2510_v27 = vpop.eup %2509 }
 0x3e0   : > { %v1453_v28 = vsel %vm792_vm3, %v2510_v27, 0.0  ;;  %v1537_v31 = vpack.c.bf16 %v2510_v27, %v2506_v60 }
 0x3e1   : > { %1454 = vadd.xlane.f32.xlu0 %v1453_v28  ;;  %v1832_v28 = vld [vmem:[#allocation14 + $0x4] sm:$0xf] }
 0x3e2   : > { %2338 = vmatmul.mubr.msk.bf16.vlgmr.msra.gmra.mxu1 %vm792_vm3, %v1537_v31  ;;  %v1886_v31 = vsel %vm1542_vm5, %v1832_v28, 0 }
 0x3e3   : > { %v2512_v32 = vpop.eup %2511  ;;  %2349 = vmatprep.mubr.msk.bf16.mxu1 %vm2783_vm0, %v2782_v0 }
 0x3e4   : > { %v1459_v54 = vsel %vm792_vm3, %v2512_v32, 0.0  ;;  %v1538_v58 = vpack.c.bf16 %v2512_v32, %v2508_v55  ;;  %v2514_v3 = vpop.eup %2513  ;;  %v1831_v55 = vld [vmem:[#allocation14] sm:$0xf] }
 0x3e5   : > { %1460 = vadd.xlane.f32.xlu0 %v1459_v54  ;;  %v2516_v13 = vpop.eup %2515  ;;  %v1430_v11 = vmul.f32 %v2514_v3, %v1422_v6  ;;  %v1839_v24 = vsel %vm1542_vm5, %v1831_v55, 0  ;;  %v1482_v6 = vld [vmem:[#allocation5 + $0x18] sm:$0xff] }
 0x3e6   : > { %2344 = vmatmul.mubr.msk.bf16.vlgmr.msra.gmra.mxu0 %vm792_vm3, %v1538_v58  ;;  %v2518_v61 = vpop.eup %2517  ;;  %v1432_v19 = vmul.f32 %v2516_v13, %v1424_v21  ;;  %2348 = vmatpush3.bf16.msra.mxu1 %v1839_v24 }
 0x3e7   : > { %2355 = vmatprep.mubr.msk.bf16.mxu0 %vm2783_vm0, %v2782_v0  ;;  %v2520_v2 = vpop.eup %2519  ;;  %v1433_v40 = vmul.f32 %v2518_v61, %v1425_v38  ;;  %2359 = vmatprep.subr.bf16.mxu1 %v2782_v0 }
 0x3e8   : > { %v2522_v8 = vpop.eup %2521  ;;  %v1435_v4 = vmul.f32 %v2520_v2, %v1427_v59  ;;  %2354 = vmatpush3.bf16.msra.mxu0 %v1886_v31  ;;  %v1486_v59 = vld [vmem:[#allocation5 + $0x38] sm:$0xff] }
 0x3e9   : > { %v2524_v15 = vpop.eup %2523  ;;  %v1431_v33 = vmul.f32 %v2522_v8, %v1423_v16  ;;  %2365 = vmatprep.subr.bf16.mxu0 %v2782_v0 }
 0x3ea   : > { %v2526_v17 = vpop.eup %2525  ;;  %v1437_v20 = vmul.f32 %v2524_v15, %v1429_v12 }
 0x3eb   : > { %v2528_v63 = vpop.eup %2527  ;;  %v1434_v29 = vmul.f32 %v2526_v17, %v1426_v26  ;;  %v1483_v26 = vld [vmem:[#allocation5 + $0x20] sm:$0xff] }
 0x3ec   : > { %v1436_v49 = vmul.f32 %v2528_v63, %v1428_v30 }
 0x3ee   : > { %1489 = vperm.xlu1 %2488, %v2514_v3   ;;  %v1479_v3 = vld [vmem:[#allocation5] sm:$0xff] }
 0x3f2   : > { %1499 = vperm.xlu1 %2488, %v2516_v13  }
 0x3f6   : > { %1504 = vperm.xlu1 %2488, %v2518_v61   ;;  %v1480_v61 = vld [vmem:[#allocation5 + $0x8] sm:$0xff] }
 0x3fa   : > { %1514 = vperm.xlu1 %2488, %v2520_v2  }
 0x3fb   : > { %1494 = vperm.xlu0 %2489, %v2522_v8  }
 0x3fe   : > { %1524 = vperm.xlu1 %2488, %v2524_v15  }
 0x3ff   : > { %1509 = vperm.xlu0 %2489, %v2526_v17  }
 0x403   : > { %1519 = vperm.xlu0 %2489, %v2528_v63  }
 0x456   : > { %v1440_v18 = vpop.xlane.xlu1 %1439 }
 0x457   : > { %v1462_v10 = vadd.f32 %v1440_v18, %v1430_v11 }
 0x459   : > { %1471 = vst.msk [vmem:[#allocation4] sm:$0xff] %vm775_vm6, %v1462_v10 }
 0x45a   : > { %v1446_v22 = vpop.xlane.xlu1 %1445 }
 0x45b   : > { %v1464_v34 = vadd.f32 %v1446_v22, %v1432_v19  ;;  %v1443_v36 = vpop.xlane.xlu0 %1442 }
 0x45c   : > { %v1463_v39 = vadd.f32 %v1443_v36, %v1431_v33 }
 0x45d   : > { %1473 = vst.msk [vmem:[#allocation4 + $0x10] sm:$0xff] %vm775_vm6, %v1464_v34 }
 0x45e   : > { %1472 = vst.msk [vmem:[#allocation4 + $0x8] sm:$0xff] %vm775_vm6, %v1463_v39 }
 0x45f   : > { %v1449_v43 = vpop.xlane.xlu0 %1448 }
 0x460   : > { %v1465_v44 = vadd.f32 %v1449_v43, %v1433_v40  ;;  %v1763_v45 = vld [vmem:[#allocation4] sm:$0xff] }
 0x461   : > { %2529 = vrcp.f32 %v1763_v45  ;;  %v1484_v45 = vld [vmem:[#allocation5 + $0x28] sm:$0xff] }
 0x462   : > { %1474 = vst.msk [vmem:[#allocation4 + $0x18] sm:$0xff] %vm775_vm6, %v1465_v44  ;;  %v1452_v46 = vpop.xlane.xlu1 %1451 }
 0x463   : > { %v1466_v48 = vadd.f32 %v1452_v46, %v1434_v29  ;;  %v1485_v29 = vld [vmem:[#allocation5 + $0x30] sm:$0xff] }
 0x464   : > { %v1765_v35 = vld [vmem:[#allocation4 + $0x10] sm:$0xff] }
 0x465   : > { %1475 = vst.msk [vmem:[#allocation4 + $0x20] sm:$0xff] %vm775_vm6, %v1466_v48  ;;  %2531 = vrcp.f32 %v1765_v35  ;;  %v1764_v52 = vld [vmem:[#allocation4 + $0x8] sm:$0xff] }
 0x466   : > { %v1458_v53 = vpop.xlane.xlu1 %1457  ;;  %2533 = vrcp.f32 %v1764_v52 }
 0x467   : > { %v1468_v37 = vadd.f32 %v1458_v53, %v1436_v49 }
 0x469   : > { %1477 = vst.msk [vmem:[#allocation4 + $0x30] sm:$0xff] %vm775_vm6, %v1468_v37  ;;  %v1766_v5 = vld [vmem:[#allocation4 + $0x18] sm:$0xff] }
 0x46a   : > { %v1455_v41 = vpop.xlane.xlu0 %1454  ;;  %2535 = vrcp.f32 %v1766_v5  ;;  %v1490_v1 = vpop.permute.xlu1 %1489 }
 0x46b   : > { %v1467_v42 = vadd.f32 %v1455_v41, %v1435_v4  ;;  %v1527_v13 = vmul.f32 %v1490_v1, %v1479_v3 }
 0x46c   : > { %v1767_v14 = vld [vmem:[#allocation4 + $0x20] sm:$0xff] }
 0x46d   : > { %1476 = vst.msk [vmem:[#allocation4 + $0x28] sm:$0xff] %vm775_vm6, %v1467_v42  ;;  %2537 = vrcp.f32 %v1767_v14 }
 0x46e   : > { %v2530_v23 = vpop.eup %2529  ;;  %v1461_v47 = vpop.xlane.xlu0 %1460 }
 0x46f   : > { %v1469_v60 = vadd.f32 %v1461_v47, %v1437_v20  ;;  %1781 = vperm.xlu0 %2489, %v2530_v23   ;;  %v1500_v7 = vpop.permute.xlu1 %1499 }
 0x470   : > { %v1769_v50 = vld [vmem:[#allocation4 + $0x30] sm:$0xff]  ;;  %v1529_v17 = vmul.f32 %v1500_v7, %v1481_v56 }
 0x471   : > { %1478 = vst.msk [vmem:[#allocation4 + $0x38] sm:$0xff] %vm775_vm6, %v1469_v60  ;;  %2539 = vrcp.f32 %v1769_v50 }
 0x472   : > { %v2532_v25 = vpop.eup %2531 }
 0x473   : > { %v2534_v27 = vpop.eup %2533  ;;  %1791 = vperm.xlu0 %2489, %v2532_v25   ;;  %v1505_v11 = vpop.permute.xlu1 %1504  ;;  %v1833_v25 = vld [vmem:[#allocation14 + $0x8] sm:$0xf] }
 0x474   : > { %1786 = vperm.xlu1 %2488, %v2534_v27   ;;  %v1768_v9 = vld [vmem:[#allocation4 + $0x28] sm:$0xff]  ;;  %v1530_v33 = vmul.f32 %v1505_v11, %v1482_v6 }
 0x475   : > { %2541 = vrcp.f32 %v1768_v9 }
 0x476   : > { %v1495_v2 = vpop.permute.xlu0 %1494 }
 0x477   : > { %v2536_v32 = vpop.eup %2535  ;;  %v1528_v18 = vmul.f32 %v1495_v2, %v1480_v61  ;;  %v1515_v43 = vpop.permute.xlu1 %1514 }
 0x478   : > { %1796 = vperm.xlu1 %2488, %v2536_v32   ;;  %v1770_v51 = vld [vmem:[#allocation4 + $0x38] sm:$0xff]  ;;  %v1532_v49 = vmul.f32 %v1515_v43, %v1484_v45  ;;  %v1933_v32 = vsel %vm1542_vm5, %v1833_v25, 0 }
 0x479   : > { %2543 = vrcp.f32 %v1770_v51 }
 0x47a   : > { %v2538_v54 = vpop.eup %2537  ;;  %v1510_v39 = vpop.permute.xlu0 %1509 }
 0x47b   : > { %1801 = vperm.xlu0 %2489, %v2538_v54   ;;  %v1531_v44 = vmul.f32 %v1510_v39, %v1483_v26  ;;  %v1525_v52 = vpop.permute.xlu1 %1524 }
 0x47c   : > { %v1534_v14 = vmul.f32 %v1525_v52, %v1486_v59  ;;  %v2248_v59 = vld [vmem:[%s3465_s5 + $0x1] ss:$0 sm:$0xff] }
 0x47e   : > { %v2540_v58 = vpop.eup %2539  ;;  %v1520_v46 = vpop.permute.xlu0 %1519 }
 0x47f   : > { %1811 = vperm.xlu0 %2489, %v2540_v58   ;;  %v1533_v53 = vmul.f32 %v1520_v46, %v1485_v29 }
 0x482   : > { %v2542_v57 = vpop.eup %2541 }
 0x483   : > { %1806 = vperm.xlu1 %2488, %v2542_v57   ;;  %v1834_v57 = vld [vmem:[#allocation14 + $0xc] sm:$0xf] }
 0x484   : > { %v1980_v7 = vsel %vm1542_vm5, %v1834_v57, 0 }
 0x486   : > { %v2544_v62 = vpop.eup %2543 }
 0x487   : > { %1816 = vperm.xlu1 %2488, %v2544_v62  }
 0x493   : > { %v1580_v8 = vpop.f32.mrf.mxu1 }
 0x494   : > { %v1728_v15 = vadd.f32 %v1580_v8, %v1527_v13 }
 0x495   : > { %v2327_v63 = vpop.f32.mrf.mxu1 }
 0x496   : > { %1736 = vst.msk [vmem:[#allocation5] sm:$0xff] %vm792_vm3, %v1728_v15  ;;  %v1627_v21 = vpop.f32.mrf.mxu0 }
 0x497   : > { %v1583_v10 = vpop.f32.mrf.mxu1  ;;  %v1730_v16 = vadd.f32 %v1627_v21, %v1529_v17 }
 0x498   : > { %v1729_v19 = vadd.f32 %v1583_v10, %v1528_v18  ;;  %v2333_v22 = vpop.f32.mrf.mxu0 }
 0x499   : > { %1738 = vst.msk [vmem:[#allocation5 + $0x10] sm:$0xff] %vm792_vm3, %v1730_v16  ;;  %v2328_v34 = vpop.f32.mrf.mxu1 }
 0x49a   : > { %1737 = vst.msk [vmem:[#allocation5 + $0x8] sm:$0xff] %vm792_vm3, %v1729_v19  ;;  %v1630_v36 = vpop.f32.mrf.mxu0 }
 0x49b   : > { %v1731_v38 = vadd.f32 %v1630_v36, %v1530_v33 }
 0x49c   : > { %v2334_v40 = vpop.f32.mrf.mxu0 }
 0x49d   : > { %1739 = vst.msk [vmem:[#allocation5 + $0x18] sm:$0xff] %vm792_vm3, %v1731_v38  ;;  %v1755_v50 = vld [vmem:[#allocation5] sm:$0xff] }
 0x4a0   : > { %v1757_v51 = vld [vmem:[#allocation5 + $0x10] sm:$0xff] }
 0x4a1   : > { %v1756_v24 = vld [vmem:[#allocation5 + $0x8] sm:$0xff] }
 0x4a2   : > { %v1674_v30 = vpop.f32.mrf.mxu1 }
 0x4a3   : > { %v1732_v48 = vadd.f32 %v1674_v30, %v1531_v44 }
 0x4a4   : > { %v2339_v35 = vpop.f32.mrf.mxu1  ;;  %v1758_v58 = vld [vmem:[#allocation5 + $0x18] sm:$0xff] }
 0x4a5   : > { %1740 = vst.msk [vmem:[#allocation5 + $0x20] sm:$0xff] %vm792_vm3, %v1732_v48 }
 0x4a6   : > { %v1677_v37 = vpop.f32.mrf.mxu1  ;;  %v1721_v4 = vpop.f32.mrf.mxu0 }
 0x4a7   : > { %v1733_v5 = vadd.f32 %v1677_v37, %v1532_v49  ;;  %v1734_v41 = vadd.f32 %v1721_v4, %v1533_v53 }
 0x4a8   : > { %v2340_v12 = vpop.f32.mrf.mxu1  ;;  %v2345_v42 = vpop.f32.mrf.mxu0 }
 0x4a9   : > { %1741 = vst.msk [vmem:[#allocation5 + $0x28] sm:$0xff] %vm792_vm3, %v1733_v5  ;;  %1742 = vst.msk [vmem:[#allocation5 + $0x30] sm:$0xff] %vm792_vm3, %v1734_v41 }
 0x4aa   : > { %v1724_v20 = vpop.f32.mrf.mxu0 }
 0x4ab   : > { %v1735_v23 = vadd.f32 %v1724_v20, %v1534_v14 }
 0x4ac   : > { %v2346_v47 = vpop.f32.mrf.mxu0  ;;  %v1759_v56 = vld [vmem:[#allocation5 + $0x20] sm:$0xff] }
 0x4ad   : > { %1743 = vst.msk [vmem:[#allocation5 + $0x38] sm:$0xff] %vm792_vm3, %v1735_v23 }
 0x4b0   : > { %v1760_v61 = vld [vmem:[#allocation5 + $0x28] sm:$0xff]  ;;  %v1761_v6 = vld [vmem:[#allocation5 + $0x30] sm:$0xff] }
 0x4b4   : > { %v1762_v18 = vld [vmem:[#allocation5 + $0x38] sm:$0xff] }
 0x4ea   : > { %v1782_v60 = vpop.permute.xlu0 %1781 }
 0x4eb   : > { %v1819_v27 = vmul.f32 %v1782_v60, %v1755_v50 }
 0x4ee   : > { %v1792_v28 = vpop.permute.xlu0 %1791 }
 0x4ef   : > { %v1787_v55 = vpop.permute.xlu1 %1786  ;;  %v1821_v62 = vmul.f32 %v1792_v28, %v1757_v51 }
 0x4f0   : > { %v1820_v9 = vmul.f32 %v1787_v55, %v1756_v24 }
 0x4f2   : > { %v1827_v31 = vpack.c.bf16 %v1820_v9, %v1819_v27 }
 0x4f3   : > { %v1797_v54 = vpop.permute.xlu1 %1796 }
 0x4f4   : > { %v1822_v1 = vmul.f32 %v1797_v54, %v1758_v58  ;;  %2350 = vmatmul.mubr.msk.bf16.vlgmr.msra.gmra.mxu1 %vm792_vm3, %v1827_v31 }
 0x4f5   : > { %2360 = vmatpush3.bf16.msra.mxu1 %v1933_v32  ;;  %2361 = vmatprep.mubr.msk.bf16.mxu1 %vm2783_vm0, %v2782_v0 }
 0x4f6   : > { %v1828_v3 = vpack.c.bf16 %v1822_v1, %v1821_v62  ;;  %v1802_v13 = vpop.permute.xlu0 %1801 }
 0x4f7   : > { %v1823_v8 = vmul.f32 %v1802_v13, %v1759_v56 }
 0x4f8   : > { %2356 = vmatmul.mubr.msk.bf16.vlgmr.msra.gmra.mxu0 %vm792_vm3, %v1828_v3 }
 0x4f9   : > { %2366 = vmatpush3.bf16.msra.mxu0 %v1980_v7  ;;  %2367 = vmatprep.mubr.msk.bf16.mxu0 %vm2783_vm0, %v2782_v0 }
 0x4fa   : > { %v1812_v17 = vpop.permute.xlu0 %1811 }
 0x4fb   : > { %v1825_v21 = vmul.f32 %v1812_v17, %v1761_v6 }
 0x4fe   : > { %v1807_v2 = vpop.permute.xlu1 %1806 }
 0x4ff   : > { %v1824_v15 = vmul.f32 %v1807_v2, %v1760_v61 }
 0x501   : > { %v1829_v63 = vpack.c.bf16 %v1824_v15, %v1823_v8 }
 0x502   : > { %v1817_v11 = vpop.permute.xlu1 %1816 }
 0x503   : > { %v1826_v10 = vmul.f32 %v1817_v11, %v1762_v18  ;;  %2362 = vmatmul.mubr.msk.bf16.vlgmr.msra.gmra.mxu1 %vm792_vm3, %v1829_v63 }
 0x505   : > { %v1830_v16 = vpack.c.bf16 %v1826_v10, %v1825_v21 }
 0x507   : > { %2368 = vmatmul.mubr.msk.bf16.vlgmr.msra.gmra.mxu0 %vm792_vm3, %v1830_v16 }
 0x5b4   : > { %v1875_v19 = vpop.f32.mrf.mxu1 }
 0x5b5   : > { %v2024_v43 = vsel %vm421_vm2, %v1875_v19, 0.0 }
 0x5b6   : > { %v2351_v0 = vpop.f32.mrf.mxu1 }
 0x5b8   : > { %v1878_v22 = vpop.f32.mrf.mxu1  ;;  %v1922_v33 = vpop.f32.mrf.mxu0 }
 0x5b9   : > { %v2025_v40 = vsel %vm421_vm2, %v1922_v33, 0.0  ;;  %v2031_v49 = vsel %vm421_vm2, %v1878_v22, 0.0 }
 0x5ba   : > { %v2352_v34 = vpop.f32.mrf.mxu1  ;;  %v2357_v36 = vpop.f32.mrf.mxu0  ;;  %v2026_v45 = vadd.f32 %v2025_v40, %v2024_v43 }
 0x5bc   : > { %v1925_v38 = vpop.f32.mrf.mxu0 }
 0x5bd   : > { %v2032_v46 = vsel %vm421_vm2, %v1925_v38, 0.0 }
 0x5be   : > { %v2358_v39 = vpop.f32.mrf.mxu0  ;;  %v2033_v37 = vadd.f32 %v2032_v46, %v2031_v49 }
 0x5c3   : > { %v1969_v26 = vpop.f32.mrf.mxu1 }
 0x5c4   : > { %v2027_v44 = vsel %vm421_vm2, %v1969_v26, 0.0 }
 0x5c5   : > { %v2363_v29 = vpop.f32.mrf.mxu1  ;;  %v2028_v30 = vadd.f32 %v2027_v44, %v2026_v45 }
 0x5c7   : > { %v1972_v48 = vpop.f32.mrf.mxu1  ;;  %v2016_v35 = vpop.f32.mrf.mxu0 }
 0x5c8   : > { %v2034_v52 = vsel %vm421_vm2, %v1972_v48, 0.0  ;;  %v2029_v53 = vsel %vm421_vm2, %v2016_v35, 0.0 }
 0x5c9   : > { %v2030_v4 = vadd.f32 %v2029_v53, %v2028_v30  ;;  %v2364_v5 = vpop.f32.mrf.mxu1  ;;  %v2369_v41 = vpop.f32.mrf.mxu0  ;;  %v2035_v12 = vadd.f32 %v2034_v52, %v2033_v37 }
 0x5cb   : > { %v2043_v42 = vadd.f32 %v2248_v59, %v2030_v4  ;;  %v2019_v14 = vpop.f32.mrf.mxu0 }
 0x5cc   : > { %v2036_v20 = vsel %vm421_vm2, %v2019_v14, 0.0 }
 0x5cd   : > { %2045 = vst.msk [vmem:[%s391_s4] sm:$0xff] %vm421_vm2, %v2043_v42  ;;  %v2037_v23 = vadd.f32 %v2036_v20, %v2035_v12  ;;  %v2370_v47 = vpop.f32.mrf.mxu0 }
 0x5cf   : > { %v2044_v60 = vadd.f32 %v2248_v59, %v2037_v23 }
 0x5d1   : > { %2046 = vst.msk [vmem:[%s391_s4 + $0x8] sm:$0xff] %vm421_vm2, %v2044_v60 }
 0x5d2   : > { %2692 = shalt.err (!%p2689_p2)
}
 0x5d3   : > { %s2693_s22 = scalar_lea.hbm %s3409_s10, 256  ;;  %s2697_s19 = scalar_lea.hbm %s3467_s7, 512 }
 0x5d4   : > { %p2694_p4 = scmp.ne.s32.totalorder %s3409_s10, %s2693_s22  ;;  %p2698_p7 = scmp.lt.s32.totalorder %s3409_s10, %s3467_s7 }
 0x5d5   : > { %p2699_p6 = scmp.lt.s32.totalorder %s2697_s19, %s2693_s22 }
 0x5d6   : > { %p2695_p1 = pnand %p2694_p4, %p2934_p5 }
 0x5d7   : > { %p2700_p12 = por %p2699_p6, %p2698_p7 }
 0x5d8   : > { %p2696_p8 = pneg %p2695_p1 }
 0x5da   : > { %p2701_p0 = pnand %p2700_p12, %p2696_p8 }
 0x5dc   : > { %2704 = shalt.err (!%p2701_p0)
}
 0x5dd   : > { %s2796_s17 = smov 128   ;;  %s2797_s20 = smov 8  }
 0x5de   : > { %2387 = dma.vmem_to_hbm [thread:$0]  (%p2934_p5), %s3411_s26, 256, %s3409_s10, %s2048_s27, %s2796_s17, %s2796_s17, %s2797_s20  }
 0x5df PF: > { %s3500_s21 = sld [smem:[#allocation23_spill]]  ;;  %s2076_s12 = sand.u32 1, %s2751_s24  }
 0x5e0   : > { %s3501_s16 = sld [smem:[#allocation22_spill]]  ;;  %s2077_s13 = scalar_lea.sflag [#allocation8], %s2076_s12 }
 0x5e5   : > { %p3502_p3 = scmp.ne.s32.totalorder %s3500_s21, 0 }
 0x5e6   : > { %p3503_p10 = scmp.ge.s32.totalorder %s3501_s16, 2 }
 0x5e8   : > { %p2407_p11 = pnand %p3503_p10, %p3502_p3 }
 0x5ea   : > { %p2408_p9 = pneg %p2407_p11 }
 0x5ec   : > { %2746 = dma.done.wait (%p2408_p9), %s2077_s13, 256  }
 0x5ed   : > { %2748 = vsyncadd (%p2408_p9), %s2077_s13, 4294967040  ;;  %s27_s29 = sadd.s32 1, %s3501_s16   ;;  %s3504_s4 = sld [smem:[#allocation21_spill]] }
 0x5ee   : > { %p24_p13 = scmp.ge.s32.totalorder %s27_s29, 4   ;;  %s3505_s26 = sld [smem:[#allocation25_spill]] }
 0x5ef   : > { %s3506_s14 = sld [smem:[#allocation24_spill]]  ;;  %s3507_s24 = smov %s2755_s25 }
 0x5f0   : > { %s3509_s27 = smov %s2767_s28 }
 0x5f1   :  { %26 = sbr.rel (!%p24_p13) target bundleno = 14 (0xe), region = 126 }
 0x5f3   : > { %s3508_s25 = smov %s3504_s4 }
 0x5f5   : > { %s3510_s28 = smov %s3506_s14 }
 0x5f6   :  { %2082 = vsyncpa [#allocation7], 1 }
 0x5f7   :  { %2084 = vsyncpa [#allocation7 + $0x1], 1 }
 0x5f8   :  { %2085 = vsyncpa [#allocation10], 1 }
 0x5f9   :  { %2087 = vsyncpa [#allocation10 + $0x1], 1 }
 0x5fa   :  { %2088 = vsyncpa [#allocation13], 1 }
 0x5fb   :  { %2089 = vsyncpa [#allocation8], 1 }
 0x5fc   :  { %2091 = vsyncpa [#allocation8 + $0x1], 1 }

</bundles_post_ra>
